<compile_context>
chip_gen: v7x
topology: tpu7x:2x2x1
jax: 0.10.0
libtpu: 0.0.40
codegen_flags: <defaults>
</compile_context>

<pallas_src>
import functools
import math

import numpy as np
import jax
import jax.numpy as jnp
from jax.experimental import pallas as pl
from jax.experimental.pallas import tpu as pltpu

_EPS = 1e-5            # nn.GroupNorm default
_NUM_GROUPS = 32       # GroupNorm(32, n_classes)
_LANES = 128           # TPU lane width


def _round_up(x, m):
    return (x + m - 1) // m * m


def _interp_points(out_size, in_size):
    """Per output index: (floor source idx, frac) for bilinear align_corners=True."""
    if in_size == 1:
        return [(0, 0.0)] * out_size
    scale = (in_size - 1) / (out_size - 1)
    pts = []
    for o in range(out_size):
        s = o * scale
        f = min(int(math.floor(s)), in_size - 2)
        pts.append((f, float(s - f)))
    return pts


def _interp_matrix(out_size, in_size):
    m = np.zeros((out_size, in_size), np.float32)
    for o, (f, t) in enumerate(_interp_points(out_size, in_size)):
        m[o, f] += 1.0 - t
        if t > 0.0:
            m[o, f + 1] += t
    return m


# ---------------------------------------------------------------------------
# Fused kernel: conv3x3 (im2col matmul) + GroupNorm(32) + ReLU (+ x2 upsample)
# ---------------------------------------------------------------------------
def _fused_kernel(x_ref, w_ref, gamma_ref, beta_ref, gmask_ref, *rest,
                  H, W, Cin, Cp, cpg, upsample):
    if upsample:
        ah_ref, o_ref, xpad_ref = rest
    else:
        o_ref, xpad_ref = rest

    # ---- zero-padded activations built in VMEM (no HBM-side jnp.pad) -----
    xpad_ref[...] = jnp.zeros_like(xpad_ref)
    xpad_ref[1:H + 1, 1:W + 1, :] = x_ref[0].astype(jnp.float32)

    # ---- 3x3 conv as ONE im2col matmul: (H*W, 9*Cin) @ (9*Cin, Cp) -------
    taps = []
    for dy in range(3):
        for dx in range(3):
            taps.append(
                xpad_ref[dy:dy + H, dx:dx + W, :].reshape(H * W, Cin))
    patches = jnp.concatenate(taps, axis=-1).astype(jnp.bfloat16)
    acc = jnp.dot(patches, w_ref[...],
                  preferred_element_type=jnp.float32)        # (H*W, Cp) f32

    # ---- GroupNorm(32): stacked sums, one group-mask matmul (f32 stats) --
    n_per_group = float(H * W * cpg)
    s1 = jnp.sum(acc, axis=0, keepdims=True)                 # (1, Cp)
    s2 = jnp.sum(acc * acc, axis=0, keepdims=True)           # (1, Cp)
    g = jnp.dot(jnp.concatenate([s1, s2], axis=0), gmask_ref[...],
                preferred_element_type=jnp.float32)          # (2, Cp)
    mean_c = g[0:1] / n_per_group
    var_c = jnp.maximum(g[1:2] / n_per_group - mean_c * mean_c, 0.0)
    inv_c = jax.lax.rsqrt(var_c + _EPS)
    scale = inv_c * gamma_ref[...]
    shift = beta_ref[...] - mean_c * scale
    y = jnp.maximum(acc * scale + shift, 0.0)                # ReLU, (H*W, Cp)

    if not upsample:
        o_ref[...] = y.reshape(1, H * W, Cp).astype(o_ref.dtype)
        return

    # ---- fused bilinear x2 upsample (align_corners=True) -----------------
    PH, PW = 2 * H, 2 * W
    # lane-dense rows (Cp == 128 keeps this a clean minor-dim merge)
    yw = y.reshape(H, W, Cp).reshape(H, W * Cp)
    th = jnp.dot(ah_ref[...], yw.astype(jnp.bfloat16),
                 preferred_element_type=jnp.float32)         # (PH, W*Cp)
    cols = []
    for f, t in _interp_points(PW, W):                       # static 2-tap lerp
        left = th[:, f * Cp:(f + 1) * Cp]
        if t == 0.0:
            cols.append(left)
        else:
            right = th[:, (f + 1) * Cp:(f + 2) * Cp]
            cols.append(left + t * (right - left))
    out = jnp.concatenate(cols, axis=-1)                     # (PH, PW*Cp)
    o_ref[...] = out.reshape(1, PH, PW * Cp).astype(o_ref.dtype)


# ---------------------------------------------------------------------------
# Wrapper: layout conversion + parameter packing + pallas_call
# ---------------------------------------------------------------------------
def conv3x3_gn_relu_forward(x_nchw, w_oihw, gamma, beta, upsample):
    N, Cin, H, W = x_nchw.shape
    Cout = w_oihw.shape[0]
    assert Cout % _NUM_GROUPS == 0
    cpg = Cout // _NUM_GROUPS
    Cp = _round_up(Cout, _LANES)

    # NHWC + bf16 input (halves activation DMA; conv accumulates in f32)
    x = jnp.transpose(x_nchw, (0, 2, 3, 1)).astype(jnp.bfloat16)

    # weights: OIHW -> (9*Cin, Cp), row order (dy, dx, cin) matches im2col
    wm = jnp.transpose(w_oihw, (2, 3, 1, 0)).reshape(9 * Cin, Cout)
    wm = jnp.pad(wm, ((0, 0), (0, Cp - Cout))).astype(jnp.bfloat16)

    gamma_p = jnp.pad(gamma.astype(jnp.float32), (0, Cp - Cout)).reshape(1, Cp)
    beta_p = jnp.pad(beta.astype(jnp.float32), (0, Cp - Cout)).reshape(1, Cp)

    cidx = np.arange(Cp)
    gmask = ((cidx[:, None] // cpg == cidx[None, :] // cpg)
             & (cidx[:, None] < Cout) & (cidx[None, :] < Cout))
    gmask = jnp.asarray(gmask.astype(np.float32))

    if upsample:
        out_rows, out_cols = 2 * H, 2 * W * Cp
    else:
        out_rows, out_cols = H * W, Cp

    in_specs = [
        pl.BlockSpec((1, H, W, Cin), lambda n: (n, 0, 0, 0)),
        pl.BlockSpec((9 * Cin, Cp), lambda n: (0, 0)),
        pl.BlockSpec((1, Cp), lambda n: (0, 0)),
        pl.BlockSpec((1, Cp), lambda n: (0, 0)),
        pl.BlockSpec((Cp, Cp), lambda n: (0, 0)),
    ]
    args = [x, wm, gamma_p, beta_p, gmask]
    if upsample:
        ah = jnp.asarray(_interp_matrix(2 * H, H)).astype(jnp.bfloat16)
        in_specs.append(pl.BlockSpec((2 * H, H), lambda n: (0, 0)))
        args.append(ah)

    kernel = functools.partial(_fused_kernel, H=H, W=W, Cin=Cin,
                               Cp=Cp, cpg=cpg, upsample=upsample)
    y = pl.pallas_call(
        kernel,
        out_shape=jax.ShapeDtypeStruct((N, out_rows, out_cols), jnp.float32),
        grid_spec=pltpu.PrefetchScalarGridSpec(
            num_scalar_prefetch=0,
            grid=(N,),
            in_specs=in_specs,
            out_specs=pl.BlockSpec((1, out_rows, out_cols),
                                   lambda n: (n, 0, 0)),
            scratch_shapes=[pltpu.VMEM((H + 2, W + 2, Cin), jnp.float32)],
        ),
        compiler_params=pltpu.CompilerParams(
            dimension_semantics=("parallel",),
            vmem_limit_bytes=48 * 1024 * 1024),
    )(*args)

    # free row-major reshape, then drop channel padding and go back to NCHW
    if upsample:
        y = y.reshape(N, 2 * H, 2 * W, Cp)
    else:
        y = y.reshape(N, H, W, Cp)
    return jnp.transpose(y[..., :Cout], (0, 3, 1, 2))


class Conv3x3GNReLU:
    """Pallas-backed equivalent of the PyTorch module (deterministic init)."""

    def __init__(self, n_channels, n_classes, upsample=False, *, key):
        assert n_classes % _NUM_GROUPS == 0
        kw, kg, kb = jax.random.split(key, 3)
        bound = 1.0 / np.sqrt(n_channels * 9)
        self.weight = jax.random.uniform(
            kw, (n_classes, n_channels, 3, 3), jnp.float32, -bound, bound)
        self.gamma = 1.0 + 0.1 * jax.random.normal(kg, (n_classes,), jnp.float32)
        self.beta = 0.1 * jax.random.normal(kb, (n_classes,), jnp.float32)
        self.upsample = upsample

    def __call__(self, x_nchw):
        return conv3x3_gn_relu_forward(x_nchw, self.weight, self.gamma,
                                       self.beta, self.upsample)


# ---------------------------------------------------------------------------
# Pure-JAX / numpy reference (f32) for verification
# ---------------------------------------------------------------------------
def reference_forward(x_nchw, w_oihw, gamma, beta, upsample):
    x = jnp.transpose(x_nchw, (0, 2, 3, 1))
    w = jnp.transpose(w_oihw, (2, 3, 1, 0))                      # HWIO
    y = jax.lax.conv_general_dilated(
        x, w, (1, 1), ((1, 1), (1, 1)),
        dimension_numbers=('NHWC', 'HWIO', 'NHWC'))
    N, H, W, C = y.shape
    cpg = C // _NUM_GROUPS
    yg = y.reshape(N, H, W, _NUM_GROUPS, cpg)
    mean = yg.mean(axis=(1, 2, 4), keepdims=True)
    var = ((yg - mean) ** 2).mean(axis=(1, 2, 4), keepdims=True)
    yn = ((yg - mean) / jnp.sqrt(var + _EPS)).reshape(N, H, W, C)
    y = jnp.maximum(yn * gamma + beta, 0.0)
    y = np.asarray(jnp.transpose(y, (0, 3, 1, 2)))               # NCHW
    if upsample:
        ah = _interp_matrix(2 * H, H)
        aw = _interp_matrix(2 * W, W)
        y = np.einsum('ph,nchw,qw->ncpq', ah, y, aw)
    return y


if __name__ == "__main__":
    key = jax.random.PRNGKey(0)
    k_x, k_params = jax.random.split(key)

    N, Cin, H, W = 2, 16, 16, 16
    Cout = 64                                 # must be divisible by 32 groups
    x = jax.random.normal(k_x, (N, Cin, H, W), dtype=jnp.float32)

    module = Conv3x3GNReLU(n_channels=Cin, n_classes=Cout, upsample=False,
                           key=k_params)

    for upsample in (False, True):
        module.upsample = upsample
        out = jax.block_until_ready(module(x))
        ref = reference_forward(x, module.weight, module.gamma, module.beta,
                                upsample)
        assert out.shape == ref.shape, (out.shape, ref.shape)
        err = float(np.max(np.abs(np.asarray(out) - ref)))
        # bf16 MXU operands => slightly looser tolerance than the all-f32 version
        assert err < 6e-2, f"mismatch (upsample={upsample}), max_err={err}"

    print("KERNEL_OK")
</pallas_src>

<mosaic_0001>
module attributes {stable_mosaic.version = 11 : i64} {
  func.func @_fused_kernel(%arg0: i32, %arg1: memref<1x16x16x16xbf16, #tpu.memory_space<vmem>>, %arg2: memref<144x128xbf16, #tpu.memory_space<vmem>>, %arg3: memref<1x128xf32, #tpu.memory_space<vmem>>, %arg4: memref<1x128xf32, #tpu.memory_space<vmem>>, %arg5: memref<128x128xf32, #tpu.memory_space<vmem>>, %arg6: memref<1x256x128xf32, #tpu.memory_space<vmem>>, %arg7: memref<18x18x16xf32, #tpu.memory_space<vmem>>) attributes {dimension_semantics = [#tpu.dimension_semantics<parallel>], iteration_bounds = array<i64: 2>, scalar_prefetch = 0 : i64, scratch_operands = 1 : i64, tpu.core_type = #tpu.core_type<tc>, window_params = [{transform_indices = @transform_0, window_bounds = array<i64: 1, 16, 16, 16>}, {pipeline_mode = #tpu.pipeline_mode<synchronous>, transform_indices = @transform_1, window_bounds = array<i64: 144, 128>}, {pipeline_mode = #tpu.pipeline_mode<synchronous>, transform_indices = @transform_2, window_bounds = array<i64: 1, 128>}, {pipeline_mode = #tpu.pipeline_mode<synchronous>, transform_indices = @transform_3, window_bounds = array<i64: 1, 128>}, {pipeline_mode = #tpu.pipeline_mode<synchronous>, transform_indices = @transform_4, window_bounds = array<i64: 128, 128>}, {transform_indices = @transform_5, window_bounds = array<i64: 1, 256, 128>}]} {
    %cst = arith.constant 0.000000e+00 : f32
    %0 = vector.broadcast %cst : f32 to vector<18x18x16xf32>
    %c0 = arith.constant 0 : index
    %c0_0 = arith.constant 0 : index
    %c0_1 = arith.constant 0 : index
    %1 = vector.load %arg7[%c0, %c0_0, %c0_1] : memref<18x18x16xf32, #tpu.memory_space<vmem>>, vector<18x18x16xf32>
    tpu.vector_store %arg7[%c0, %c0_0, %c0_1], %0 {strides = array<i32>} : memref<18x18x16xf32, #tpu.memory_space<vmem>>, vector<18x18x16xf32>,
    %c0_2 = arith.constant 0 : index
    %c0_3 = arith.constant 0 : index
    %c0_4 = arith.constant 0 : index
    %c0_5 = arith.constant 0 : index
    %2 = vector.load %arg1[%c0_2, %c0_3, %c0_4, %c0_5] : memref<1x16x16x16xbf16, #tpu.memory_space<vmem>>, vector<1x16x16x16xbf16>
    %3 = vector.shape_cast %2 : vector<1x16x16x16xbf16> to vector<16x16x16xbf16>
    %4 = arith.extf %3 : vector<16x16x16xbf16> to vector<16x16x16xf32>
    %c1 = arith.constant 1 : index
    %c1_6 = arith.constant 1 : index
    %c0_7 = arith.constant 0 : index
    %5 = vector.load %arg7[%c1, %c1_6, %c0_7] : memref<18x18x16xf32, #tpu.memory_space<vmem>>, vector<16x16x16xf32>
    tpu.vector_store %arg7[%c1, %c1_6, %c0_7], %4 {strides = array<i32>} : memref<18x18x16xf32, #tpu.memory_space<vmem>>, vector<16x16x16xf32>,
    %c0_8 = arith.constant 0 : index
    %c0_9 = arith.constant 0 : index
    %c0_10 = arith.constant 0 : index
    %6 = vector.load %arg7[%c0_8, %c0_9, %c0_10] : memref<18x18x16xf32, #tpu.memory_space<vmem>>, vector<16x16x16xf32>
    %7 = vector.shape_cast %6 : vector<16x16x16xf32> to vector<256x16xf32>
    %c0_11 = arith.constant 0 : index
    %c1_12 = arith.constant 1 : index
    %c0_13 = arith.constant 0 : index
    %8 = vector.load %arg7[%c0_11, %c1_12, %c0_13] : memref<18x18x16xf32, #tpu.memory_space<vmem>>, vector<16x16x16xf32>
    %9 = vector.shape_cast %8 : vector<16x16x16xf32> to vector<256x16xf32>
    %c0_14 = arith.constant 0 : index
    %c2 = arith.constant 2 : index
    %c0_15 = arith.constant 0 : index
    %10 = vector.load %arg7[%c0_14, %c2, %c0_15] : memref<18x18x16xf32, #tpu.memory_space<vmem>>, vector<16x16x16xf32>
    %11 = vector.shape_cast %10 : vector<16x16x16xf32> to vector<256x16xf32>
    %c1_16 = arith.constant 1 : index
    %c0_17 = arith.constant 0 : index
    %c0_18 = arith.constant 0 : index
    %12 = vector.load %arg7[%c1_16, %c0_17, %c0_18] : memref<18x18x16xf32, #tpu.memory_space<vmem>>, vector<16x16x16xf32>
    %13 = vector.shape_cast %12 : vector<16x16x16xf32> to vector<256x16xf32>
    %c1_19 = arith.constant 1 : index
    %c1_20 = arith.constant 1 : index
    %c0_21 = arith.constant 0 : index
    %14 = vector.load %arg7[%c1_19, %c1_20, %c0_21] : memref<18x18x16xf32, #tpu.memory_space<vmem>>, vector<16x16x16xf32>
    %15 = vector.shape_cast %14 : vector<16x16x16xf32> to vector<256x16xf32>
    %c1_22 = arith.constant 1 : index
    %c2_23 = arith.constant 2 : index
    %c0_24 = arith.constant 0 : index
    %16 = vector.load %arg7[%c1_22, %c2_23, %c0_24] : memref<18x18x16xf32, #tpu.memory_space<vmem>>, vector<16x16x16xf32>
    %17 = vector.shape_cast %16 : vector<16x16x16xf32> to vector<256x16xf32>
    %c2_25 = arith.constant 2 : index
    %c0_26 = arith.constant 0 : index
    %c0_27 = arith.constant 0 : index
    %18 = vector.load %arg7[%c2_25, %c0_26, %c0_27] : memref<18x18x16xf32, #tpu.memory_space<vmem>>, vector<16x16x16xf32>
    %19 = vector.shape_cast %18 : vector<16x16x16xf32> to vector<256x16xf32>
    %c2_28 = arith.constant 2 : index
    %c1_29 = arith.constant 1 : index
    %c0_30 = arith.constant 0 : index
    %20 = vector.load %arg7[%c2_28, %c1_29, %c0_30] : memref<18x18x16xf32, #tpu.memory_space<vmem>>, vector<16x16x16xf32>
    %21 = vector.shape_cast %20 : vector<16x16x16xf32> to vector<256x16xf32>
    %c2_31 = arith.constant 2 : index
    %c2_32 = arith.constant 2 : index
    %c0_33 = arith.constant 0 : index
    %22 = vector.load %arg7[%c2_31, %c2_32, %c0_33] : memref<18x18x16xf32, #tpu.memory_space<vmem>>, vector<16x16x16xf32>
    %23 = vector.shape_cast %22 : vector<16x16x16xf32> to vector<256x16xf32>
    %24 = tpu.concatenate %7, %9, %11, %13, %15, %17, %19, %21, %23 in 1 : vector<256x16xf32>, vector<256x16xf32>, vector<256x16xf32>, vector<256x16xf32>, vector<256x16xf32>, vector<256x16xf32>, vector<256x16xf32>, vector<256x16xf32>, vector<256x16xf32> -> vector<256x144xf32>
    %25 = arith.truncf %24 : vector<256x144xf32> to vector<256x144xbf16>
    %c0_34 = arith.constant 0 : index
    %c0_35 = arith.constant 0 : index
    %26 = vector.load %arg2[%c0_34, %c0_35] : memref<144x128xbf16, #tpu.memory_space<vmem>>, vector<144x128xbf16>
    %cst_36 = arith.constant dense<0.000000e+00> : vector<256x128xf32>
    %27 = tpu.matmul %25, %26, %cst_36 {dimension_numbers = #tpu.dot_dimension_numbers<[1], [0], [0], [1], [0, 0, 1, 1], [], []>} : vector<256x144xbf16>, vector<144x128xbf16>, vector<256x128xf32> -> vector<256x128xf32>
    %cst_37 = arith.constant dense<0.000000e+00> : vector<128xf32>
    %28 = vector.multi_reduction <add>, %27, %cst_37 [0] : vector<256x128xf32> to vector<128xf32>
    %29 = vector.shape_cast %28 : vector<128xf32> to vector<1x128xf32>
    %30 = arith.mulf %27, %27 : vector<256x128xf32>
    %cst_38 = arith.constant dense<0.000000e+00> : vector<128xf32>
    %31 = vector.multi_reduction <add>, %30, %cst_38 [0] : vector<256x128xf32> to vector<128xf32>
    %32 = vector.shape_cast %31 : vector<128xf32> to vector<1x128xf32>
    %33 = tpu.concatenate %29, %32 in 0 : vector<1x128xf32>, vector<1x128xf32> -> vector<2x128xf32>
    %c0_39 = arith.constant 0 : index
    %c0_40 = arith.constant 0 : index
    %34 = vector.load %arg5[%c0_39, %c0_40] : memref<128x128xf32, #tpu.memory_space<vmem>>, vector<128x128xf32>
    %cst_41 = arith.constant dense<0.000000e+00> : vector<2x128xf32>
    %35 = tpu.matmul %33, %34, %cst_41 {dimension_numbers = #tpu.dot_dimension_numbers<[1], [0], [0], [1], [0, 0, 1, 1], [], []>} : vector<2x128xf32>, vector<128x128xf32>, vector<2x128xf32> -> vector<2x128xf32>
    %36 = vector.extract_strided_slice %35 {offsets = [0, 0], sizes = [1, 128], strides = [1, 1]} : vector<2x128xf32> to vector<1x128xf32>
    %cst_42 = arith.constant 5.120000e+02 : f32
    %37 = vector.broadcast %cst_42 : f32 to vector<1x128xf32>
    %38 = arith.divf %36, %37 : vector<1x128xf32>
    %39 = vector.extract_strided_slice %35 {offsets = [1, 0], sizes = [1, 128], strides = [1, 1]} : vector<2x128xf32> to vector<1x128xf32>
    %cst_43 = arith.constant 5.120000e+02 : f32
    %40 = vector.broadcast %cst_43 : f32 to vector<1x128xf32>
    %41 = arith.divf %39, %40 : vector<1x128xf32>
    %42 = arith.mulf %38, %38 : vector<1x128xf32>
    %43 = arith.subf %41, %42 : vector<1x128xf32>
    %cst_44 = arith.constant 0.000000e+00 : f32
    %44 = vector.broadcast %cst_44 : f32 to vector<1x128xf32>
    %45 = arith.maximumf %43, %44 : vector<1x128xf32>
    %cst_45 = arith.constant 9.99999974E-6 : f32
    %46 = vector.broadcast %cst_45 : f32 to vector<1x128xf32>
    %47 = arith.addf %45, %46 : vector<1x128xf32>
    %48 = math.rsqrt %47 : vector<1x128xf32>
    %c0_46 = arith.constant 0 : index
    %c0_47 = arith.constant 0 : index
    %49 = vector.load %arg3[%c0_46, %c0_47] : memref<1x128xf32, #tpu.memory_space<vmem>>, vector<1x128xf32>
    %50 = arith.mulf %48, %49 : vector<1x128xf32>
    %c0_48 = arith.constant 0 : index
    %c0_49 = arith.constant 0 : index
    %51 = vector.load %arg4[%c0_48, %c0_49] : memref<1x128xf32, #tpu.memory_space<vmem>>, vector<1x128xf32>
    %52 = arith.mulf %38, %50 : vector<1x128xf32>
    %53 = arith.subf %51, %52 : vector<1x128xf32>
    %54 = vector.broadcast %50 : vector<1x128xf32> to vector<256x128xf32>
    %55 = arith.mulf %27, %54 : vector<256x128xf32>
    %56 = vector.broadcast %53 : vector<1x128xf32> to vector<256x128xf32>
    %57 = arith.addf %55, %56 : vector<256x128xf32>
    %cst_50 = arith.constant 0.000000e+00 : f32
    %58 = vector.broadcast %cst_50 : f32 to vector<256x128xf32>
    %59 = arith.maximumf %57, %58 : vector<256x128xf32>
    %60 = vector.shape_cast %59 : vector<256x128xf32> to vector<1x256x128xf32>
    %c0_51 = arith.constant 0 : index
    %c0_52 = arith.constant 0 : index
    %c0_53 = arith.constant 0 : index
    %61 = vector.load %arg6[%c0_51, %c0_52, %c0_53] : memref<1x256x128xf32, #tpu.memory_space<vmem>>, vector<1x256x128xf32>
    tpu.vector_store %arg6[%c0_51, %c0_52, %c0_53], %60 {strides = array<i32>} : memref<1x256x128xf32, #tpu.memory_space<vmem>>, vector<1x256x128xf32>,
    return
  }
  func.func @transform_0(%arg0: i32) -> (i32, i32, i32, i32) {
    %c0_i32 = arith.constant 0 : i32
    %c0_i32_0 = arith.constant 0 : i32
    %c0_i32_1 = arith.constant 0 : i32
    %c0_i32_2 = arith.constant 0 : i32
    return %arg0, %c0_i32, %c0_i32_0, %c0_i32_1 : i32, i32, i32, i32
  }
  func.func @transform_1(%arg0: i32) -> (i32, i32) {
    %c0_i32 = arith.constant 0 : i32
    %c0_i32_0 = arith.constant 0 : i32
    %c0_i32_1 = arith.constant 0 : i32
    return %c0_i32, %c0_i32_0 : i32, i32
  }
  func.func @transform_2(%arg0: i32) -> (i32, i32) {
    %c0_i32 = arith.constant 0 : i32
    %c0_i32_0 = arith.constant 0 : i32
    %c0_i32_1 = arith.constant 0 : i32
    return %c0_i32, %c0_i32_0 : i32, i32
  }
  func.func @transform_3(%arg0: i32) -> (i32, i32) {
    %c0_i32 = arith.constant 0 : i32
    %c0_i32_0 = arith.constant 0 : i32
    %c0_i32_1 = arith.constant 0 : i32
    return %c0_i32, %c0_i32_0 : i32, i32
  }
  func.func @transform_4(%arg0: i32) -> (i32, i32) {
    %c0_i32 = arith.constant 0 : i32
    %c0_i32_0 = arith.constant 0 : i32
    %c0_i32_1 = arith.constant 0 : i32
    return %c0_i32, %c0_i32_0 : i32, i32
  }
  func.func @transform_5(%arg0: i32) -> (i32, i32, i32) {
    %c0_i32 = arith.constant 0 : i32
    %c0_i32_0 = arith.constant 0 : i32
    %c0_i32_1 = arith.constant 0 : i32
    return %arg0, %c0_i32, %c0_i32_0 : i32, i32, i32
  }
}

</mosaic_0001>

<bundles_post_ra>
// kernel: tpu_custom_call.1
= control target key start
LH: loop header
LB: loop body
LE: loop exit
PB: predicated region body
PF: predicated region fallthrough
CT: control target
= control target key end

     0   :  { %10 = vsyncpa [#allocation4], 0  ;;  %s4947_s0 = inlined_call_operand.hbm [shape: bf16[2,16,16,16], index: 0, kind: input, shape index: {}]   ;;  %s4948_s1 = inlined_call_operand.hbm [shape: bf16[144,128], index: 1, kind: input, shape index: {}]   ;;  %s4949_s2 = inlined_call_operand.vmem [shape: f32[1,128], index: 2, kind: input, shape index: {}]   ;;  %s4950_s3 = inlined_call_operand.vmem [shape: f32[1,128], index: 3, kind: input, shape index: {}]   ;;  %s4951_s4 = inlined_call_operand.hbm [shape: f32[128,128], index: 4, kind: input, shape index: {}]   ;;  %s4952_s5 = inlined_call_operand.hbm [shape: f32[2,256,128], index: 5, kind: output, shape index: {}]  }
   0x1   :  { %12 = vsyncpa [#allocation4 + $0x1], 0 }
   0x2   :  { %13 = vsyncpa [#allocation7], 0 }
   0x3   :  { %14 = vsyncpa [#allocation5], 0 }
   0x4   :  { %16 = vsyncpa [#allocation5 + $0x1], 0  ;;  %s3699_s18 = smov 0   ;;  %s3701_s19 = smov 0  }
   0x5   :  { %s3703_s20 = smov 0   ;;  %s3705_s21 = smov 0  }
   0x6 LB: > { %s3720_s22 = sadd.s32 4294967295, %s3646_s21   ;;  %s2616_s23 = sadd.s32 4294967294, %s3646_s21   ;;  %s3646_s21 = sphi %s3705_s21, %s4972_s21   ;;  %s3642_s20 = sphi %s3703_s20, %s4971_s20   ;;  %s3638_s19 = sphi %s3701_s19, %s4970_s19   ;;  %s3634_s18 = sphi %s3699_s18, %s4969_s18  }
   0x7   : > { %p42_p0 = scmp.ne.s32.totalorder %s3638_s19, %s3634_s18  ;;  %p4953_p1 = scmp.eq.s32.totalorder %s3720_s22, 0 }
   0x8   : > { %p156_p3 = scmp.eq.s32.totalorder %s2616_s23, 1  ;;  %p2617_p5 = scmp.ge.s32.totalorder %s3646_s21, 1 }
   0x9   : > { %p3729_p4 = por %p4953_p1, %p42_p0  ;;  %p163_p7 = scmp.lt.s32.totalorder %s3646_s21, 3 }
   0xa   : > { %p3734_p6 = por %p156_p3, %p42_p0  ;;  %s3648_s27 = smov [#allocation6]  }
   0xb   : > { %s4956_s24 = scalar_select %p3729_p4, 1, 0 }
   0xc   : > { %s4957_s25 = scalar_select %p3734_p6, 1, 0 }
   0xd   : > { %p3739_p8 = pnand %p2617_p5, %p163_p7  ;;  %s175_s28 = sshll.u32 %s3648_s27, 4  ;;  %s3743_s28 = int_to_ptr.vmem [resolvable:$true] %s175_s28 }
   0xe   : > { %s3649_s30 = smov [#allocation8]   ;;  %s3490_s9 = scalar_lea.hbm %s4948_s1, 1152 }
   0xf   : > { %p2847_p9 = pneg %p3739_p8  ;;  %s194_s6 = sshll.u32 %s3649_s30, 4  ;;  %s3754_s6 = int_to_ptr.vmem [resolvable:$true] %s194_s6 }
  0x10   : > { %p3491_p12 = scmp.ne.s32.totalorder %s4948_s1, %s3490_s9  ;;  %p3497_p5 = scmp.lt.u32.totalorder %s3490_s9, %s4948_s1 }
  0x11   : > { %p3750_p11 = pnand %p2847_p9, %p4953_p1 }
  0x13   : > { %p3492_p13 = pneg %p3750_p11 }
  0x15   : > { %p3493_p0 = pnand %p3492_p13, %p3491_p12 }
  0x17   : > { %p3494_p3 = pneg %p3493_p0 }
  0x19   : > { %p3499_p7 = pnand %p3497_p5, %p3494_p3 }
  0x1b   : > { %3502 = shalt.err (!%p3499_p7)
}
  0x1c   : > { %s3503_s14 = scalar_lea.vmem %s3743_s28, 1152  ;;  %p3511_p2 = scmp.lt.s32.totalorder %s3743_s28, %s3743_s28 }
  0x1d   : > { %p3504_p9 = scmp.ne.s32.totalorder %s3743_s28, %s3503_s14  ;;  %p3512_p12 = scmp.lt.s32.totalorder %s3503_s14, %s3503_s14 }
  0x1f   : > { %p3506_p10 = pnand %p3504_p9, %p3492_p13  ;;  %p3513_p0 = por %p3512_p12, %p3511_p2 }
  0x21   : > { %p3507_p1 = pneg %p3506_p10 }
  0x23   : > { %p3514_p6 = pnand %p3513_p0, %p3507_p1 }
  0x25   : > { %3517 = shalt.err (!%p3514_p6)
}
  0x26   : > { %s3650_s15 = smov 64   ;;  %s3651_s16 = smov 4  }
  0x27   : > { %2850 = dma.hbm_to_vmem [thread:$0]  (!%p3750_p11), %s4948_s1, 1152, %s3743_s28, [#allocation7], %s3650_s15, %s3650_s15, %s3651_s16  }
  0x28   : > { %s3518_s7 = scalar_lea.hbm %s4951_s4, 2048 }
  0x29   : > { %p3519_p1 = scmp.ne.s32.totalorder %s4951_s4, %s3518_s7  ;;  %p3525_p10 = scmp.lt.u32.totalorder %s3518_s7, %s4951_s4 }
  0x2b   : > { %p3521_p2 = pnand %p3519_p1, %p3492_p13 }
  0x2d   : > { %p3522_p6 = pneg %p3521_p2 }
  0x2f   : > { %p3527_p3 = pnand %p3525_p10, %p3522_p6 }
  0x31   : > { %3530 = shalt.err (!%p3527_p3)
}
  0x32   : > { %s3531_s28 = scalar_lea.vmem %s3754_s6, 2048  ;;  %p3539_p12 = scmp.lt.s32.totalorder %s3754_s6, %s3754_s6 }
  0x33   : > { %p3532_p5 = scmp.ne.s32.totalorder %s3754_s6, %s3531_s28  ;;  %p3540_p0 = scmp.lt.s32.totalorder %s3531_s28, %s3531_s28 }
  0x35   : > { %p3534_p7 = pnand %p3532_p5, %p3492_p13  ;;  %p3541_p1 = por %p3540_p0, %p3539_p12 }
  0x37   : > { %p3535_p9 = pneg %p3534_p7 }
  0x39   : > { %p3542_p2 = pnand %p3541_p1, %p3535_p9 }
  0x3b   : > { %3545 = shalt.err (!%p3542_p2)
}
  0x3c   : > { %s3652_s12 = smov 128   ;;  %s3653_s13 = smov 8  }
  0x3d   : > { %2853 = dma.hbm_to_vmem [thread:$0]  (!%p3750_p11), %s4951_s4, 2048, %s3754_s6, [#allocation7], %s3652_s12, %s3652_s12, %s3653_s13  }
  0x3e   : > { %s3812_s23 = sadd.s32 1, %s3646_s21   ;;  %s29_s30 = sadd.s32 1, %s3642_s20 }
  0x3f   : > { %s26_s27 = ssub.s32 %s3646_s21, %s3812_s23  ;;  %p36_p6 = scmp.ne.s32.totalorder %s3642_s20, %s3638_s19 }
  0x40   : > { %p27_p13 = scmp.eq.s32.totalorder %s26_s27, 0  ;;  %p37_p10 = scmp.eq.s32.totalorder %s3646_s21, 0 }
  0x41   : > { %p4960_p5 = scmp.eq.s32.totalorder %s3720_s22, 1  ;;  %p2864_p9 = scmp.lt.s32.totalorder %s3646_s21, 2 }
  0x42   : > { %s3821_s7 = scalar_select %p27_p13, %s3642_s20, %s29_s30  }
  0x43   : > { %p38_p3 = por %p37_p10, %p36_p6  ;;  %p3825_p7 = por %p4960_p5, %p36_p6 }
  0x44   : > { %s208_s29 = sand.u32 1, %s3642_s20   ;;  %s2660_s6 = sshll.u32 %s3646_s21, 11 }
  0x45   : > { %s4961_s8 = scalar_select %p3825_p7, 1, 0 }
  0x46   : > { %s2621_s9 = sshll.u32 %s208_s29, 7  ;;  %s3835_s28 = scalar_lea.hbm %s4947_s0, %s2660_s6 }
  0x47   : > { %s212_s12 = scalar_lea.vmem [#allocation3], %s2621_s9  ;;  %p3839_p11 = pnand %p2864_p9, %p38_p3 }
  0x48   : > { %s219_s13 = sshll.u32 %s212_s12, 4  ;;  %s3843_s17 = scalar_lea.sflag [#allocation4], %s208_s29  ;;  %s3837_s13 = int_to_ptr.vmem [resolvable:$true] %s219_s13 }
  0x49   : > { %s3546_s27 = scalar_lea.hbm %s3835_s28, 2048  ;;  %p3548_p0 = pneg %p3839_p11 }
  0x4a   : > { %p3547_p12 = scmp.ne.s32.totalorder %s3835_s28, %s3546_s27  ;;  %s3551_s6 = scalar_lea.hbm %s4947_s0, 4096 }
  0x4b   : > { %p3552_p13 = scmp.lt.u32.totalorder %s3835_s28, %s4947_s0  ;;  %p3553_p6 = scmp.lt.u32.totalorder %s3551_s6, %s3546_s27 }
  0x4c   : > { %p3549_p1 = pnand %p3548_p0, %p3547_p12  ;;  %p3555_p3 = scmp.lt.u32.totalorder %s3546_s27, %s3835_s28 }
  0x4d   : > { %p3554_p10 = por %p3553_p6, %p3552_p13 }
  0x4e   : > { %p3550_p2 = pneg %p3549_p1 }
  0x4f   : > { %p3556_p5 = por %p3555_p3, %p3554_p10 }
  0x51   : > { %p3557_p9 = pnand %p3556_p5, %p3550_p2 }
  0x53   : > { %3560 = shalt.err (!%p3557_p9)
}
  0x54   : > { %s3561_s29 = scalar_lea.vmem %s3837_s13, 2048  ;;  %s3654_s12 = smov [#allocation3]  }
  0x55   : > { %p3562_p12 = scmp.ne.s32.totalorder %s3837_s13, %s3561_s29  ;;  %s3566_s30 = sshll.u32 %s3654_s12, 4  ;;  %s3567_s30 = int_to_ptr.vmem [resolvable:$false] %s3566_s30 }
  0x56   : > { %s3568_s9 = scalar_lea.vmem %s3567_s30, 4096  ;;  %p3569_p4 = scmp.lt.s32.totalorder %s3837_s13, %s3567_s30 }
  0x57   : > { %p3564_p1 = pnand %p3562_p12, %p3548_p0  ;;  %p3570_p13 = scmp.lt.s32.totalorder %s3568_s9, %s3561_s29 }
  0x59   : > { %p3565_p7 = pneg %p3564_p1  ;;  %p3571_p6 = por %p3570_p13, %p3569_p4 }
  0x5b   : > { %p3572_p10 = pnand %p3571_p6, %p3565_p7 }
  0x5d   : > { %3575 = shalt.err (!%p3572_p10)
}
  0x5e   : > { %2857 = dma.hbm_to_vmem [thread:$0]  (!%p3839_p11), %s3835_s28, 2048, %s3837_s13, %s3843_s17, %s3650_s15, %s3650_s15, %s3651_s16  }
  0x5f   : > { %231 = sbr.rel (%p3739_p8) target bundleno = 1004 (0x3ec), region = 40  ;;  %s3877_s27 = sand.u32 (!%p3739_p8), 1, %s3638_s19  }
  0x60   : > { %s2625_s6 = sshll.u32 (!%p3739_p8), %s3877_s27, 7  ;;  %s234_s10 = scalar_lea.sflag (!%p3739_p8), [#allocation4], %s3877_s27 }
  0x61   : > { %s3881_s11 = scalar_lea.vmem (!%p3739_p8), [#allocation3], %s2625_s6  ;;  %p4963_p4 = scmp.ne.s32.totalorder (!%p3739_p8), %s4956_s24, 0 }
  0x66   : > { %3621 = dma.done.wait (%p4963_p4), %s234_s10, 2048  }
  0x67   : > { %3623 = vsyncadd (%p4963_p4), %s234_s10, 4294965248  ;;  %p4964_p7 = scmp.eq.s32.totalorder %s3720_s22, 0 }
  0x69   : > { %3625 = dma.done.wait (%p4964_p7), [#allocation7], 3200   ;;  %p4965_p8 = pmov %p4964_p7 }
  0x6a   : > { %vm273_vm0 = vcmask 130048   ;;  %vm276_vm1 = vcmask 123904   ;;  %v3655_v0 = vmov 0.0   ;;  %v3656_v1 = vmov 0   ;;  %v2663_v2 = vld [vmem:[%s3881_s11] sm:$0xff]   ;;  %v2726_v3 = vld [vmem:[%s3881_s11 + $0x8] sm:$0xff]  }
  0x6b   : > { %3627 = vsyncadd (%p4965_p8), [#allocation7], 4294964096  ;;  %274 = vst.msk [vmem:[#allocation2] sm:$0xff] %vm273_vm0, %v3655_v0  ;;  %1993 = vmatprep.subr.bf16.mxu0 %v3656_v1  ;;  %2817 = vmatprep.subr.bf16.mxu1 %v3656_v1  ;;  %v2727_v4 = vld [vmem:[%s3881_s11 + $0x10] sm:$0xff]   ;;  %v2664_v8 = vunpack.c.l.bf16 %v2663_v2  ;;  %v2665_v9 = vunpack.c.h.bf16 %v2663_v2  ;;  %v2668_v10 = vunpack.c.l.bf16 %v2726_v3  ;;  %v2669_v11 = vunpack.c.h.bf16 %v2726_v3  ;;  %v2728_v16 = vld [vmem:[%s3881_s11 + $0x18] sm:$0xff]   ;;  %s3657_s24 = smov 16  }
  0x6c   : > { %275 = vst.msk [vmem:[#allocation2 + $0x8] sm:$0xff] %vm273_vm0, %v3655_v0  ;;  %278 = vst.msk [vmem:[#allocation2 + $0x18] sm:$0xff] %vm273_vm0, %v3655_v0  ;;  %v2672_v14 = vunpack.c.l.bf16 %v2727_v4  ;;  %v2673_v15 = vunpack.c.h.bf16 %v2727_v4  ;;  %v2729_v17 = vld [vmem:[%s3881_s11 + $0x20] sm:$0xff]   ;;  %v2676_v19 = vunpack.c.l.bf16 %v2728_v16  ;;  %v2677_v20 = vunpack.c.h.bf16 %v2728_v16  ;;  %v2730_v22 = vld [vmem:[%s3881_s11 + $0x28] sm:$0xff]   ;;  %s3658_s26 = smov 32   ;;  %s3659_s15 = smov 48  }
  0x6d   : > { %277 = vst.msk [vmem:[#allocation2 + $0x10] sm:$0x3] %vm276_vm1, %v3655_v0  ;;  %280 = vst.msk [vmem:[#allocation2 + $0x28] sm:$0x3] %vm276_vm1, %v3655_v0  ;;  %v2680_v21 = vunpack.c.l.bf16 %v2729_v17  ;;  %v2733_v23 = vld [vmem:[%s3881_s11 + $0x40] sm:$0xff]   ;;  %v2731_v24 = vld [vmem:[%s3881_s11 + $0x30] sm:$0xff]   ;;  %v2681_v25 = vunpack.c.h.bf16 %v2729_v17  ;;  %v2684_v26 = vunpack.c.l.bf16 %v2730_v22  ;;  %v2685_v27 = vunpack.c.h.bf16 %v2730_v22 }
  0x6e   : > { %279 = vst.msk [vmem:[#allocation2 + $0x20] sm:$0xff] %vm273_vm0, %v3655_v0  ;;  %281 = vst.msk [vmem:[#allocation2 + $0x30] sm:$0xff] %vm273_vm0, %v3655_v0  ;;  %v2696_v28 = vunpack.c.l.bf16 %v2733_v23  ;;  %v2734_v29 = vld [vmem:[%s3881_s11 + $0x48] sm:$0xff]   ;;  %v2697_v30 = vunpack.c.h.bf16 %v2733_v23  ;;  %v2688_v31 = vunpack.c.l.bf16 %v2731_v24  ;;  %v2689_v32 = vunpack.c.h.bf16 %v2731_v24  ;;  %v3479_v34 = vld [vmem:[#allocation6] sm:$0xff]   ;;  %s3660_s16 = smov 80   ;;  %s3661_s28 = smov 64  }
  0x6f   : > { %282 = vst.msk [vmem:[#allocation2 + $0x38] sm:$0xff] %vm273_vm0, %v3655_v0  ;;  %284 = vst.msk [vmem:[#allocation2 + $0x48] sm:$0xff] %vm273_vm0, %v3655_v0  ;;  %v2700_v33 = vunpack.c.l.bf16 %v2734_v29  ;;  %v2735_v35 = vld [vmem:[%s3881_s11 + $0x50] sm:$0xff]   ;;  %v2701_v36 = vunpack.c.h.bf16 %v2734_v29  ;;  %1994 = vmatpush1.bf16.msra.mxu0 %v3479_v34  ;;  %v3480_v39 = vld [vmem:[#allocation6 + $0x8] sm:$0xff]   ;;  %2826 = vmatpush1.bf16.msra.mxu1 %v3479_v34  ;;  %s3662_s13 = smov 112   ;;  %s3663_s14 = smov 96  }
  0x70   : > { %283 = vst.msk [vmem:[#allocation2 + $0x40] sm:$0x3] %vm276_vm1, %v3655_v0  ;;  %286 = vst.msk [vmem:[#allocation2 + $0x58] sm:$0x3] %vm276_vm1, %v3655_v0  ;;  %v2704_v37 = vunpack.c.l.bf16 %v2735_v35  ;;  %v2705_v38 = vunpack.c.h.bf16 %v2735_v35  ;;  %v2732_v40 = vld [vmem:[%s3881_s11 + $0x38] sm:$0xff]   ;;  %1995 = vmatprep.subr.bf16.mxu0 %v3656_v1  ;;  %v3481_v43 = vld [vmem:[#allocation6 + $0x10] sm:$0xff]   ;;  %2818 = vmatprep.subr.bf16.mxu1 %v3656_v1 }
  0x71   : > { %285 = vst.msk [vmem:[#allocation2 + $0x50] sm:$0xff] %vm273_vm0, %v3655_v0  ;;  %287 = vst.msk [vmem:[#allocation2 + $0x60] sm:$0xff] %vm273_vm0, %v3655_v0  ;;  %v2692_v41 = vunpack.c.l.bf16 %v2732_v40  ;;  %v2693_v42 = vunpack.c.h.bf16 %v2732_v40  ;;  %v3482_v60 = vld [vmem:[#allocation6 + $0x18] sm:$0xff]   ;;  %v3485_v16 = vld [vmem:[#allocation6 + $0x30] sm:$0xff]   ;;  %vm1643_vm2 = vcmask 261120   ;;  %vm1676_vm3 = vcmask 392192  }
  0x72   : > { %288 = vst.msk [vmem:[#allocation2 + $0x68] sm:$0xff] %vm273_vm0, %v3655_v0  ;;  %290 = vst.msk [vmem:[#allocation2 + $0x78] sm:$0xff] %vm273_vm0, %v3655_v0  ;;  %v2737_v17 = vld [vmem:[%s3881_s11 + $0x60] sm:$0xff]   ;;  %vm1709_vm4 = vcmask 523264   ;;  %vm1742_vm5 = vcmask 654336   ;;  %vm1775_vm6 = vcmask 785408  }
  0x73   : > { %289 = vst.msk [vmem:[#allocation2 + $0x70] sm:$0x3] %vm276_vm1, %v3655_v0  ;;  %292 = vst.msk [vmem:[#allocation2 + $0x88] sm:$0x3] %vm276_vm1, %v3655_v0  ;;  %v458_v5 = vld [vmem:[#allocation2 + $0x1] sm:$0xff]  ;;  %1996 = vmatpush1.bf16.msra.mxu0 %v3480_v39  ;;  %2827 = vmatpush1.bf16.msra.mxu1 %v3480_v39  ;;  %vm1808_vm7 = vcmask 916480  }
  0x74   : > { %291 = vst.msk [vmem:[#allocation2 + $0x80] sm:$0xff] %vm273_vm0, %v3655_v0  ;;  %293 = vst.msk [vmem:[#allocation2 + $0x90] sm:$0xff] %vm273_vm0, %v3655_v0  ;;  %v459_v6 = vld [vmem:[#allocation2 + $0x9] sm:$0xff]  ;;  %1997 = vmatprep.subr.bf16.mxu0 %v3656_v1  ;;  %2819 = vmatprep.subr.bf16.mxu1 %v3656_v1  ;;  %vm3665_vm8 = vmmov 0   ;;  %vm2260_vm9 = vcmask 1040384   ;;  %s2628_s9 = sshll.u32 %s3877_s27, 8 }
  0x75   : > { %294 = vst.msk [vmem:[#allocation2 + $0x98] sm:$0xff] %vm273_vm0, %v3655_v0  ;;  %296 = vst.msk [vmem:[#allocation2 + $0xa8] sm:$0xff] %vm273_vm0, %v3655_v0  ;;  %v490_v7 = vld [vmem:[#allocation2 + $0x2] sm:$0xff]  ;;  %v2919_v12 = vpack.i.bf16 %v459_v6, %v458_v5  ;;  %v491_v13 = vld [vmem:[#allocation2 + $0xa] sm:$0xff]  ;;  %s4847_s6 = scalar_lea.vmem [#allocation9], %s2628_s9  ;;  %s2661_s10 = sshll.u32 %s3720_s22, 12 }
  0x76   : > { %295 = vst.msk [vmem:[#allocation2 + $0xa0] sm:$0x3] %vm276_vm1, %v3655_v0  ;;  %298 = vst.msk [vmem:[#allocation2 + $0xb8] sm:$0x3] %vm276_vm1, %v3655_v0  ;;  %v2924_v18 = vpack.i.bf16 %v491_v13, %v490_v7  ;;  %v2736_v13 = vld [vmem:[%s3881_s11 + $0x58] sm:$0xff]   ;;  %p4966_p0 = scmp.ne.s32.totalorder %s4961_s8, 0 }
  0x77   : > { %297 = vst.msk [vmem:[#allocation2 + $0xb0] sm:$0xff] %vm273_vm0, %v3655_v0  ;;  %299 = vst.msk [vmem:[#allocation2 + $0xc0] sm:$0xff] %vm273_vm0, %v3655_v0  ;;  %2920 = vrot.lane.b32.xlu0 %v2919_v12, %s3657_s24  ;;  %1998 = vmatpush1.bf16.msra.mxu0 %v3481_v43 }
  0x78   : > { %300 = vst.msk [vmem:[#allocation2 + $0xc8] sm:$0xff] %vm273_vm0, %v3655_v0  ;;  %302 = vst.msk [vmem:[#allocation2 + $0xd8] sm:$0xff] %vm273_vm0, %v3655_v0  ;;  %2828 = vmatpush1.bf16.msra.mxu1 %v3481_v43  ;;  %1999 = vmatprep.subr.bf16.mxu0 %v3656_v1 }
  0x79   : > { %301 = vst.msk [vmem:[#allocation2 + $0xd0] sm:$0x3] %vm276_vm1, %v3655_v0  ;;  %304 = vst.msk [vmem:[#allocation2 + $0xe8] sm:$0x3] %vm276_vm1, %v3655_v0  ;;  %2820 = vmatprep.subr.bf16.mxu1 %v3656_v1 }
  0x7a   : > { %303 = vst.msk [vmem:[#allocation2 + $0xe0] sm:$0xff] %vm273_vm0, %v3655_v0  ;;  %305 = vst.msk [vmem:[#allocation2 + $0xf0] sm:$0xff] %vm273_vm0, %v3655_v0 }
  0x7b   : > { %306 = vst.msk [vmem:[#allocation2 + $0xf8] sm:$0xff] %vm273_vm0, %v3655_v0  ;;  %308 = vst.msk [vmem:[#allocation2 + $0x108] sm:$0xff] %vm273_vm0, %v3655_v0  ;;  %2925 = vrot.lane.b32.xlu0 %v2924_v18, %s3658_s26  ;;  %2000 = vmatpush1.bf16.msra.mxu0 %v3482_v60 }
  0x7c   : > { %307 = vst.msk [vmem:[#allocation2 + $0x100] sm:$0x3] %vm276_vm1, %v3655_v0  ;;  %310 = vst.msk [vmem:[#allocation2 + $0x118] sm:$0x3] %vm276_vm1, %v3655_v0  ;;  %2829 = vmatpush1.bf16.msra.mxu1 %v3482_v60  ;;  %2001 = vmatprep.subr.bf16.mxu0 %v3656_v1 }
  0x7d   : > { %309 = vst.msk [vmem:[#allocation2 + $0x110] sm:$0xff] %vm273_vm0, %v3655_v0  ;;  %311 = vst.msk [vmem:[#allocation2 + $0x120] sm:$0xff] %vm273_vm0, %v3655_v0  ;;  %2821 = vmatprep.subr.bf16.mxu1 %v3656_v1 }
  0x7e   : > { %312 = vst.msk [vmem:[#allocation2 + $0x128] sm:$0xff] %vm273_vm0, %v3655_v0  ;;  %314 = vst.msk [vmem:[#allocation2 + $0x138] sm:$0xff] %vm273_vm0, %v3655_v0 }
  0x7f   : > { %313 = vst.msk [vmem:[#allocation2 + $0x130] sm:$0x3] %vm276_vm1, %v3655_v0  ;;  %316 = vst.msk [vmem:[#allocation2 + $0x148] sm:$0x3] %vm276_vm1, %v3655_v0 }
  0x80   : > { %315 = vst.msk [vmem:[#allocation2 + $0x140] sm:$0xff] %vm273_vm0, %v3655_v0  ;;  %317 = vst.msk [vmem:[#allocation2 + $0x150] sm:$0xff] %vm273_vm0, %v3655_v0 }
  0x81   : > { %318 = vst.msk [vmem:[#allocation2 + $0x158] sm:$0xff] %vm273_vm0, %v3655_v0  ;;  %320 = vst.msk [vmem:[#allocation2 + $0x168] sm:$0xff] %vm273_vm0, %v3655_v0 }
  0x82   : > { %319 = vst.msk [vmem:[#allocation2 + $0x160] sm:$0x3] %vm276_vm1, %v3655_v0  ;;  %322 = vst.msk [vmem:[#allocation2 + $0x178] sm:$0x3] %vm276_vm1, %v3655_v0 }
  0x83   : > { %321 = vst.msk [vmem:[#allocation2 + $0x170] sm:$0xff] %vm273_vm0, %v3655_v0  ;;  %323 = vst.msk [vmem:[#allocation2 + $0x180] sm:$0xff] %vm273_vm0, %v3655_v0 }
  0x84   : > { %324 = vst.msk [vmem:[#allocation2 + $0x188] sm:$0xff] %vm273_vm0, %v3655_v0  ;;  %326 = vst.msk [vmem:[#allocation2 + $0x198] sm:$0xff] %vm273_vm0, %v3655_v0 }
  0x85   : > { %325 = vst.msk [vmem:[#allocation2 + $0x190] sm:$0x3] %vm276_vm1, %v3655_v0  ;;  %328 = vst.msk [vmem:[#allocation2 + $0x1a8] sm:$0x3] %vm276_vm1, %v3655_v0 }
  0x86   : > { %327 = vst.msk [vmem:[#allocation2 + $0x1a0] sm:$0xff] %vm273_vm0, %v3655_v0  ;;  %394 = vst.msk [vmem:[#allocation2 + $0x19] sm:$0xff] %vm273_vm0, %v2664_v8 }
  0x87   : > { %395 = vst.msk [vmem:[#allocation2 + $0x21] sm:$0xff] %vm273_vm0, %v2665_v9  ;;  %396 = vst.msk [vmem:[#allocation2 + $0x31] sm:$0xff] %vm273_vm0, %v2668_v10  ;;  %v3483_v10 = vld [vmem:[#allocation6 + $0x20] sm:$0xff]  }
  0x88   : > { %397 = vst.msk [vmem:[#allocation2 + $0x39] sm:$0xff] %vm273_vm0, %v2669_v11  ;;  %398 = vst.msk [vmem:[#allocation2 + $0x49] sm:$0xff] %vm273_vm0, %v2672_v14  ;;  %2002 = vmatpush1.bf16.msra.mxu0 %v3483_v10  ;;  %v3484_v11 = vld [vmem:[#allocation6 + $0x28] sm:$0xff]   ;;  %2830 = vmatpush1.bf16.msra.mxu1 %v3483_v10  ;;  %v2708_v14 = vunpack.c.l.bf16 %v2736_v13 }
  0x89   : > { %399 = vst.msk [vmem:[#allocation2 + $0x51] sm:$0xff] %vm273_vm0, %v2673_v15  ;;  %400 = vst.msk [vmem:[#allocation2 + $0x61] sm:$0xff] %vm273_vm0, %v2676_v19  ;;  %2003 = vmatprep.subr.bf16.mxu0 %v3656_v1  ;;  %2822 = vmatprep.subr.bf16.mxu1 %v3656_v1  ;;  %v2709_v15 = vunpack.c.h.bf16 %v2736_v13 }
  0x8a   : > { %401 = vst.msk [vmem:[#allocation2 + $0x69] sm:$0xff] %vm273_vm0, %v2677_v20  ;;  %402 = vst.msk [vmem:[#allocation2 + $0x79] sm:$0xff] %vm273_vm0, %v2680_v21  ;;  %v2712_v20 = vunpack.c.l.bf16 %v2737_v17  ;;  %v2713_v21 = vunpack.c.h.bf16 %v2737_v17 }
  0x8b   : > { %403 = vst.msk [vmem:[#allocation2 + $0x81] sm:$0xff] %vm273_vm0, %v2681_v25  ;;  %404 = vst.msk [vmem:[#allocation2 + $0x91] sm:$0xff] %vm273_vm0, %v2684_v26  ;;  %v3486_v25 = vld [vmem:[#allocation6 + $0x38] sm:$0xff]  }
  0x8c   : > { %405 = vst.msk [vmem:[#allocation2 + $0x99] sm:$0xff] %vm273_vm0, %v2685_v27  ;;  %410 = vst.msk [vmem:[#allocation2 + $0xd9] sm:$0xff] %vm273_vm0, %v2696_v28  ;;  %2004 = vmatpush1.bf16.msra.mxu0 %v3484_v11  ;;  %2831 = vmatpush1.bf16.msra.mxu1 %v3484_v11 }
  0x8d   : > { %411 = vst.msk [vmem:[#allocation2 + $0xe1] sm:$0xff] %vm273_vm0, %v2697_v30  ;;  %406 = vst.msk [vmem:[#allocation2 + $0xa9] sm:$0xff] %vm273_vm0, %v2688_v31  ;;  %v4036_v44 = vld [vmem:[#allocation2 + $0x18] sm:$0xff]  ;;  %2005 = vmatprep.subr.bf16.mxu0 %v3656_v1  ;;  %2823 = vmatprep.subr.bf16.mxu1 %v3656_v1  ;;  %v3487_v30 = vld [vmem:[#allocation6 + $0x40] sm:$0xff]  }
  0x8e   : > { %407 = vst.msk [vmem:[#allocation2 + $0xb1] sm:$0xff] %vm273_vm0, %v2689_v32  ;;  %412 = vst.msk [vmem:[#allocation2 + $0xf1] sm:$0xff] %vm273_vm0, %v2700_v33  ;;  %v4038_v45 = vld [vmem:[#allocation2 + $0x20] sm:$0xff]  ;;  %v651_v52 = vld [vmem:[#allocation2 + $0x31] sm:$0xff] }
  0x8f   : > { %413 = vst.msk [vmem:[#allocation2 + $0xf9] sm:$0xff] %vm273_vm0, %v2701_v36  ;;  %414 = vst.msk [vmem:[#allocation2 + $0x109] sm:$0xff] %vm273_vm0, %v2704_v37  ;;  %v586_v46 = vld [vmem:[#allocation2 + $0x1a] sm:$0xff]  ;;  %v2929_v47 = vpack.i.bf16 %v4038_v45, %v4036_v44  ;;  %v587_v48 = vld [vmem:[#allocation2 + $0x22] sm:$0xff] }
  0x90   : > { %415 = vst.msk [vmem:[#allocation2 + $0x111] sm:$0xff] %vm273_vm0, %v2705_v38  ;;  %408 = vst.msk [vmem:[#allocation2 + $0xc1] sm:$0xff] %vm273_vm0, %v2692_v41  ;;  %v554_v49 = vld [vmem:[#allocation2 + $0x19] sm:$0xff]  ;;  %v555_v50 = vld [vmem:[#allocation2 + $0x21] sm:$0xff]  ;;  %v2939_v51 = vpack.i.bf16 %v587_v48, %v586_v46  ;;  %2006 = vmatpush1.bf16.msra.mxu0 %v3485_v16  ;;  %2832 = vmatpush1.bf16.msra.mxu1 %v3485_v16 }
  0x91   : > { %409 = vst.msk [vmem:[#allocation2 + $0xc9] sm:$0xff] %vm273_vm0, %v2693_v42  ;;  %v652_v53 = vld [vmem:[#allocation2 + $0x39] sm:$0xff]  ;;  %2930 = vrot.lane.b32.xlu1 %v2929_v47, %s3659_s15  ;;  %v2934_v54 = vpack.i.bf16 %v555_v50, %v554_v49  ;;  %v4047_v55 = vld [vmem:[#allocation2 + $0x30] sm:$0xff]  ;;  %v4063_v63 = vld [vmem:[#allocation2 + $0x48] sm:$0xff]  ;;  %2007 = vmatprep.subr.bf16.mxu0 %v3656_v1 }
  0x92   : > { %2940 = vrot.lane.b32.xlu0 %v2939_v51, %s3660_s16  ;;  %v2949_v56 = vpack.i.bf16 %v652_v53, %v651_v52  ;;  %v4050_v57 = vld [vmem:[#allocation2 + $0x38] sm:$0xff]  ;;  %v4065_v2 = vld [vmem:[#allocation2 + $0x50] sm:$0xff]  ;;  %416 = vst.msk [vmem:[#allocation2 + $0x121] sm:$0xff] %vm273_vm0, %v2708_v14  ;;  %417 = vst.msk [vmem:[#allocation2 + $0x129] sm:$0xff] %vm273_vm0, %v2709_v15  ;;  %2824 = vmatprep.subr.bf16.mxu1 %v3656_v1 }
  0x93   : > { %v588_v58 = vld [vmem:[#allocation2 + $0x32] sm:$0xff]  ;;  %v589_v59 = vld [vmem:[#allocation2 + $0x3a] sm:$0xff]  ;;  %v2944_v62 = vpack.i.bf16 %v4050_v57, %v4047_v55  ;;  %v2979_v3 = vpack.i.bf16 %v4065_v2, %v4063_v63  ;;  %v4071_v4 = vld [vmem:[#allocation2 + $0x4a] sm:$0xff]  ;;  %418 = vst.msk [vmem:[#allocation2 + $0x139] sm:$0xff] %vm273_vm0, %v2712_v20 }
  0x94   : > { %v1842_v61 = vpack.c.bf16 %v589_v59, %v588_v58  ;;  %v4073_v5 = vld [vmem:[#allocation2 + $0x52] sm:$0xff]  ;;  %v2974_v7 = vpack.i.bf16 %v589_v59, %v588_v58  ;;  %v653_v8 = vld [vmem:[#allocation2 + $0x49] sm:$0xff]  ;;  %v655_v19 = vld [vmem:[#allocation2 + $0x61] sm:$0xff]  ;;  %419 = vst.msk [vmem:[#allocation2 + $0x141] sm:$0xff] %vm273_vm0, %v2713_v21  ;;  %2008 = vmatpush1.bf16.msra.mxu0 %v3486_v25  ;;  %2833 = vmatpush1.bf16.msra.mxu1 %v3486_v25 }
  0x95   : > { %2935 = vrot.lane.b32.xlu1 %v2934_v54, %s3661_s28  ;;  %v1844_v6 = vpack.c.bf16 %v4073_v5, %v4071_v4  ;;  %v654_v9 = vld [vmem:[#allocation2 + $0x51] sm:$0xff]  ;;  %v3009_v18 = vpack.i.bf16 %v4073_v5, %v4071_v4  ;;  %v656_v22 = vld [vmem:[#allocation2 + $0x69] sm:$0xff]  ;;  %v4104_v28 = vld [vmem:[#allocation2 + $0x60] sm:$0xff]  ;;  %2009 = vmatprep.subr.bf16.mxu0 %v3656_v1 }
  0x96   : > { %2638 = vmatprep.mubr.msk.bf16.mxu0 %vm273_vm0, %v1842_v61  ;;  %2950 = vrot.lane.b32.xlu0 %v2949_v56, %s3662_s13  ;;  %v2984_v12 = vpack.i.bf16 %v654_v9, %v653_v8  ;;  %v4093_v23 = vld [vmem:[#allocation2 + $0x62] sm:$0xff]  ;;  %v4095_v24 = vld [vmem:[#allocation2 + $0x6a] sm:$0xff]  ;;  %v3019_v27 = vpack.i.bf16 %v656_v22, %v655_v19  ;;  %v2738_v32 = vld [vmem:[%s3881_s11 + $0x68] sm:$0xff]  }
  0x97   : > { %v1846_v26 = vpack.c.bf16 %v4095_v24, %v4093_v23  ;;  %v4106_v29 = vld [vmem:[#allocation2 + $0x68] sm:$0xff]  ;;  %2825 = vmatprep.subr.bf16.mxu1 %v3656_v1  ;;  %v2716_v33 = vunpack.c.l.bf16 %v2738_v32  ;;  %v2717_v34 = vunpack.c.h.bf16 %v2738_v32  ;;  %v625_v35 = vld [vmem:[#allocation2 + $0x78] sm:$0xff]  ;;  %v626_v36 = vld [vmem:[#allocation2 + $0x80] sm:$0xff]  ;;  %v3044_v40 = vpack.i.bf16 %v4095_v24, %v4093_v23 }
  0x98   : > { %v3014_v31 = vpack.i.bf16 %v4106_v29, %v4104_v28  ;;  %2010 = vmatpush1.bf16.msra.mxu0 %v3487_v30  ;;  %2834 = vmatpush1.bf16.msra.mxu1 %v3487_v30  ;;  %v3049_v1 = vpack.i.bf16 %v626_v36, %v625_v35  ;;  %v4122_v37 = vld [vmem:[#allocation2 + $0x7a] sm:$0xff]  ;;  %v4124_v38 = vld [vmem:[#allocation2 + $0x82] sm:$0xff]  ;;  %v659_v50 = vld [vmem:[#allocation2 + $0x91] sm:$0xff] }
  0x99   : > { %2945 = vrot.lane.b32.xlu1 %v2944_v62, %s3663_s14  ;;  %420 = vst.msk [vmem:[#allocation2 + $0x151] sm:$0xff] %vm273_vm0, %v2716_v33  ;;  %421 = vst.msk [vmem:[#allocation2 + $0x159] sm:$0xff] %vm273_vm0, %v2717_v34  ;;  %v1848_v39 = vpack.c.bf16 %v4124_v38, %v4122_v37  ;;  %v657_v41 = vld [vmem:[#allocation2 + $0x79] sm:$0xff]  ;;  %v658_v42 = vld [vmem:[#allocation2 + $0x81] sm:$0xff]  ;;  %v3079_v49 = vpack.i.bf16 %v4124_v38, %v4122_v37 }
  0x9a   : > { %2960 = vrot.lane.b32.xlu0 %v2939_v51, %s3658_s26  ;;  %v3054_v43 = vpack.i.bf16 %v658_v42, %v657_v41  ;;  %v2739_v46 = vld [vmem:[%s3881_s11 + $0x70] sm:$0xff]   ;;  %v627_v53 = vld [vmem:[#allocation2 + $0x90] sm:$0xff]  ;;  %v2740_v58 = vld [vmem:[%s3881_s11 + $0x78] sm:$0xff]   ;;  %s2524_s11 = sshll.u32 %s4847_s6, 4  ;;  %s4889_s11 = int_to_ptr.vmem [resolvable:$true] %s2524_s11 }
  0x9b   : > { %v2720_v47 = vunpack.c.l.bf16 %v2739_v46  ;;  %v2721_v48 = vunpack.c.h.bf16 %v2739_v46  ;;  %v660_v51 = vld [vmem:[#allocation2 + $0x99] sm:$0xff]  ;;  %v2724_v59 = vunpack.c.l.bf16 %v2740_v58  ;;  %v2725_v60 = vunpack.c.h.bf16 %v2740_v58  ;;  %v477_v8 = vld [vmem:[#allocation2 + $0xe1] sm:$0xff]  ;;  %v630_v10 = vld [vmem:[#allocation2 + $0xb0] sm:$0xff] }
  0x9c   : > { %v3089_v52 = vpack.i.bf16 %v660_v51, %v659_v50  ;;  %v596_v61 = vld [vmem:[#allocation2 + $0x92] sm:$0xff]  ;;  %v629_v9 = vld [vmem:[#allocation2 + $0xa8] sm:$0xff]  ;;  %v508_v13 = vld [vmem:[#allocation2 + $0xda] sm:$0xff] }
  0x9d   : > { %2955 = vrot.lane.b32.xlu1 %v2934_v54, %s3657_s24  ;;  %422 = vst.msk [vmem:[#allocation2 + $0x169] sm:$0xff] %vm273_vm0, %v2720_v47  ;;  %423 = vst.msk [vmem:[#allocation2 + $0x171] sm:$0xff] %vm273_vm0, %v2721_v48  ;;  %v628_v54 = vld [vmem:[#allocation2 + $0x98] sm:$0xff]  ;;  %v509_v14 = vld [vmem:[#allocation2 + $0xe2] sm:$0xff] }
  0x9e   : > { %2970 = vrot.lane.b32.xlu0 %v2949_v56, %s3661_s28  ;;  %424 = vst.msk [vmem:[#allocation2 + $0x181] sm:$0xff] %vm273_vm0, %v2724_v59  ;;  %425 = vst.msk [vmem:[#allocation2 + $0x189] sm:$0xff] %vm273_vm0, %v2725_v60  ;;  %v661_v15 = vld [vmem:[#allocation2 + $0xa9] sm:$0xff]  ;;  %v662_v16 = vld [vmem:[#allocation2 + $0xb1] sm:$0xff]  ;;  %v4158_v17 = vpack.i.bf16 %v509_v14, %v508_v13 }
  0x9f   : > { %v540_v19 = vld [vmem:[#allocation2 + $0xf0] sm:$0xff]  ;;  %v541_v20 = vld [vmem:[#allocation2 + $0xf8] sm:$0xff]  ;;  %v637_v33 = vld [vmem:[#allocation2 + $0x108] sm:$0xff] }
  0xa0   : > { %v4163_v21 = vpack.i.bf16 %v541_v20, %v540_v19  ;;  %v572_v22 = vld [vmem:[#allocation2 + $0xf1] sm:$0xff]  ;;  %v573_v25 = vld [vmem:[#allocation2 + $0xf9] sm:$0xff]  ;;  %v669_v41 = vld [vmem:[#allocation2 + $0x109] sm:$0xff] }
  0xa1   : > { %2965 = vrot.lane.b32.xlu1 %v2944_v62, %s3659_s15  ;;  %v597_v62 = vld [vmem:[#allocation2 + $0x9a] sm:$0xff]  ;;  %v604_v30 = vld [vmem:[#allocation2 + $0xf2] sm:$0xff]  ;;  %v701_v35 = vld [vmem:[#allocation2 + $0x10a] sm:$0xff] }
  0xa2   : > { %2980 = vrot.lane.b32.xlu0 %v2979_v3, %s3663_s14  ;;  %v638_v34 = vld [vmem:[#allocation2 + $0x110] sm:$0xff]  ;;  %v632_v50 = vld [vmem:[#allocation2 + $0xc8] sm:$0xff]  ;;  %v639_v20 = vld [vmem:[#allocation2 + $0x120] sm:$0xff] }
  0xa3   : > { %v702_v36 = vld [vmem:[#allocation2 + $0x112] sm:$0xff]  ;;  %v4334_v38 = vld [vmem:[#allocation2 + $0x13a] sm:$0xff] }
  0xa4   : > { %v670_v42 = vld [vmem:[#allocation2 + $0x111] sm:$0xff]  ;;  %v673_v24 = vld [vmem:[#allocation2 + $0x139] sm:$0xff] }
  0xa5   : > { %2975 = vrot.lane.b32.xlu1 %v2974_v7, %s3660_s16  ;;  %v599_v46 = vld [vmem:[#allocation2 + $0xb2] sm:$0xff]  ;;  %v4178_v47 = vpack.i.bf16 %v670_v42, %v669_v41 }
  0xa6   : > { %2990 = vrot.lane.b32.xlu0 %v2949_v56, %s3657_s24  ;;  %v3084_v56 = vpack.i.bf16 %v628_v54, %v627_v53  ;;  %v664_v53 = vld [vmem:[#allocation2 + $0xc9] sm:$0xff] }
  0xa9   : > { %2985 = vrot.lane.b32.xlu1 %v2984_v12, %s3662_s13 }
  0xaa   : > { %3000 = vrot.lane.b32.xlu0 %v2979_v3, %s3659_s15  ;;  %v3119_v3 = vpack.i.bf16 %v597_v62, %v596_v61  ;;  %v427_v61 = vld [vmem:[#allocation2 + $0x8] sm:$0xff]  ;;  %v426_v62 = vld [vmem:[#allocation2] sm:$0xff] }
  0xad   : > { %2995 = vrot.lane.b32.xlu1 %v2974_v7, %s3658_s26  ;;  %v476_v7 = vld [vmem:[#allocation2 + $0xd9] sm:$0xff] }
  0xae   : > { %3010 = vrot.lane.b32.xlu0 %v3009_v18, %s3660_s16  ;;  %v4153_v11 = vpack.i.bf16 %v477_v8, %v476_v7  ;;  %v606_v8 = vld [vmem:[#allocation2 + $0x10a] sm:$0xff] }
  0xb1   : > { %3005 = vrot.lane.b32.xlu1 %v2984_v12, %s3661_s28 }
  0xb2   : > { %3020 = vrot.lane.b32.xlu0 %v3019_v27, %s3662_s13 }
  0xb5   : > { %3015 = vrot.lane.b32.xlu1 %v3014_v31, %s3663_s14 }
  0xb6   : > { %3030 = vrot.lane.b32.xlu0 %v3009_v18, %s3658_s26  ;;  %v3139_v18 = vpack.i.bf16 %v662_v16, %v661_v15 }
  0xb9   : > { %3025 = vrot.lane.b32.xlu1 %v2984_v12, %s3657_s24  ;;  %v3129_v12 = vpack.i.bf16 %v630_v10, %v629_v9  ;;  %v607_v9 = vld [vmem:[#allocation2 + $0x112] sm:$0xff] }
  0xba   : > { %3040 = vrot.lane.b32.xlu0 %v3019_v27, %s3661_s28  ;;  %v4198_v19 = vpack.i.bf16 %v607_v9, %v606_v8 }
  0xbd   : > { %3035 = vrot.lane.b32.xlu1 %v3014_v31, %s3659_s15  ;;  %v605_v31 = vld [vmem:[#allocation2 + $0xfa] sm:$0xff] }
  0xbe   : > { %3050 = vrot.lane.b32.xlu0 %v3049_v1, %s3663_s14  ;;  %v3154_v32 = vpack.i.bf16 %v605_v31, %v604_v30 }
  0xc1   : > { %3045 = vrot.lane.b32.xlu1 %v3044_v40, %s3660_s16 }
  0xc2   : > { %3060 = vrot.lane.b32.xlu0 %v3019_v27, %s3657_s24  ;;  %v4168_v27 = vpack.i.bf16 %v573_v25, %v572_v22  ;;  %v640_v22 = vld [vmem:[#allocation2 + $0x128] sm:$0xff] }
  0xc5   : > { %3055 = vrot.lane.b32.xlu1 %v3054_v43, %s3662_s13 }
  0xc6   : > { %3070 = vrot.lane.b32.xlu0 %v3049_v1, %s3659_s15  ;;  %v1860_v1 = vpack.c.bf16 %v702_v36, %v701_v35 }
  0xc8   : > { %2647 = vmatprep.mubr.msk.bf16.mxu1 %vm273_vm0, %v1860_v1 }
  0xc9   : > { %3065 = vrot.lane.b32.xlu1 %v3044_v40, %s3658_s26  ;;  %v3164_v40 = vpack.i.bf16 %v638_v34, %v637_v33  ;;  %v4203_v34 = vpack.i.bf16 %v640_v22, %v639_v20 }
  0xca   : > { %3080 = vrot.lane.b32.xlu0 %v3079_v49, %s3660_s16 }
  0xcd   : > { %3075 = vrot.lane.b32.xlu1 %v3054_v43, %s3661_s28 }
  0xce   : > { %3090 = vrot.lane.b32.xlu0 %v3089_v52, %s3662_s13 }
  0xd1   : > { %3085 = vrot.lane.b32.xlu1 %v3084_v56, %s3663_s14 }
  0xd2   : > { %3100 = vrot.lane.b32.xlu0 %v3079_v49, %s3658_s26  ;;  %v631_v49 = vld [vmem:[#allocation2 + $0xc0] sm:$0xff] }
  0xd3   : > { %v3199_v51 = vpack.i.bf16 %v632_v50, %v631_v49 }
  0xd5   : > { %3095 = vrot.lane.b32.xlu1 %v3054_v43, %s3657_s24  ;;  %v598_v43 = vld [vmem:[#allocation2 + $0xaa] sm:$0xff] }
  0xd6   : > { %3110 = vrot.lane.b32.xlu0 %v3089_v52, %s3661_s28  ;;  %v3189_v48 = vpack.i.bf16 %v599_v46, %v598_v43  ;;  %v671_v43 = vld [vmem:[#allocation2 + $0x121] sm:$0xff]  ;;  %v672_v46 = vld [vmem:[#allocation2 + $0x129] sm:$0xff] }
  0xd9   : > { %3105 = vrot.lane.b32.xlu1 %v3084_v56, %s3659_s15 }
  0xda   : > { %3120 = vrot.lane.b32.xlu0 %v3119_v3, %s3660_s16 }
  0xdd   : > { %3115 = vrot.lane.b32.xlu1 %v4153_v11, %s3657_s24 }
  0xde   : > { %3130 = vrot.lane.b32.xlu0 %v3129_v12, %s3663_s14 }
  0xe1   : > { %3125 = vrot.lane.b32.xlu1 %v4158_v17, %s3658_s26 }
  0xe2   : > { %3140 = vrot.lane.b32.xlu0 %v3139_v18, %s3662_s13 }
  0xe5   : > { %3135 = vrot.lane.b32.xlu1 %v4163_v21, %s3659_s15 }
  0xe6   : > { %3150 = vrot.lane.b32.xlu0 %v3089_v52, %s3657_s24  ;;  %v663_v52 = vld [vmem:[#allocation2 + $0xc1] sm:$0xff] }
  0xe7   : > { %v4187_v56 = vpack.i.bf16 %v664_v53, %v663_v52  ;;  %v600_v52 = vld [vmem:[#allocation2 + $0xc2] sm:$0xff]  ;;  %v601_v53 = vld [vmem:[#allocation2 + $0xca] sm:$0xff] }
  0xe9   : > { %3145 = vrot.lane.b32.xlu1 %v4168_v27, %s3661_s28  ;;  %v2921_v54 = vpop.permute.xlu0 %2920 }
  0xea   : > { %3160 = vrot.lane.b32.xlu0 %v3119_v3, %s3658_s26  ;;  %v2923_v59 = vunpack.i.h.bf16 %v2921_v54  ;;  %v2922_v60 = vunpack.i.l.bf16 %v2921_v54 }
  0xec   : > { %v1612_v10 = vsel %vm273_vm0, %v427_v61, %v2923_v59 }
  0xed   : > { %3155 = vrot.lane.b32.xlu1 %v3154_v32, %s3660_s16  ;;  %v2926_v58 = vpop.permute.xlu0 %2925 }
  0xee   : > { %3170 = vrot.lane.b32.xlu0 %v3129_v12, %s3659_s15  ;;  %v2928_v3 = vunpack.i.h.bf16 %v2926_v58  ;;  %v2927_v7 = vunpack.i.l.bf16 %v2926_v58  ;;  %v1611_v12 = vsel %vm273_vm0, %v426_v62, %v2922_v60  ;;  %v4214_v60 = vpack.i.bf16 %v672_v46, %v671_v43 }
  0xef   : > { %v4220_v62 = vpack.i.bf16 %v601_v53, %v600_v52 }
  0xf0   : > { %v1645_v25 = vsel %vm1643_vm2, %v1612_v10, %v2928_v3 }
  0xf1   : > { %3165 = vrot.lane.b32.xlu1 %v3164_v40, %s3663_s14 }
  0xf2   : > { %3180 = vrot.lane.b32.xlu0 %v3139_v18, %s3661_s28 }
  0xf5   : > { %3175 = vrot.lane.b32.xlu1 %v4178_v47, %s3662_s13 }
  0xf6   : > { %3190 = vrot.lane.b32.xlu0 %v3189_v48, %s3660_s16 }
  0xf9   : > { %3185 = vrot.lane.b32.xlu1 %v4168_v27, %s3657_s24 }
  0xfa   : > { %3200 = vrot.lane.b32.xlu0 %v3199_v51, %s3663_s14 }
  0xfd   : > { %3195 = vrot.lane.b32.xlu1 %v3154_v32, %s3658_s26 }
  0xfe   : > { %3210 = vrot.lane.b32.xlu0 %v4187_v56, %s3662_s13 }
 0x101   : > { %3205 = vrot.lane.b32.xlu1 %v3164_v40, %s3659_s15 }
 0x102   : > { %3220 = vrot.lane.b32.xlu0 %v3139_v18, %s3657_s24  ;;  %v1644_v18 = vsel %vm1643_vm2, %v1611_v12, %v2927_v7  ;;  %v4226_v12 = vld [vmem:[#allocation2 + $0xd8] sm:$0xff] }
 0x103   : > { %v2931_v13 = vpop.permute.xlu1 %2930 }
 0x104   : > { %v2941_v14 = vpop.permute.xlu0 %2940  ;;  %v2933_v15 = vunpack.i.h.bf16 %v2931_v13  ;;  %v2932_v16 = vunpack.i.l.bf16 %v2931_v13  ;;  %v4228_v13 = vld [vmem:[#allocation2 + $0xe0] sm:$0xff] }
 0x105   : > { %3215 = vrot.lane.b32.xlu1 %v4178_v47, %s3661_s28  ;;  %v2943_v1 = vunpack.i.h.bf16 %v2941_v14  ;;  %v2942_v40 = vunpack.i.l.bf16 %v2941_v14 }
 0x106   : > { %3230 = vrot.lane.b32.xlu0 %v3189_v48, %s3658_s26  ;;  %v1677_v35 = vsel %vm1676_vm3, %v1644_v18, %v2932_v16  ;;  %v1678_v36 = vsel %vm1676_vm3, %v1645_v25, %v2933_v15 }
 0x107   : > { %v2936_v30 = vpop.permute.xlu1 %2935 }
 0x108   : > { %v2938_v31 = vunpack.i.h.bf16 %v2936_v30  ;;  %v2937_v32 = vunpack.i.l.bf16 %v2936_v30  ;;  %v2951_v33 = vpop.permute.xlu0 %2950 }
 0x109   : > { %3225 = vrot.lane.b32.xlu1 %v4198_v19, %s3660_s16  ;;  %v2953_v48 = vunpack.i.h.bf16 %v2951_v33  ;;  %v2952_v49 = vunpack.i.l.bf16 %v2951_v33 }
 0x10a   : > { %v1710_v41 = vsel %vm1709_vm4, %v1677_v35, %v2937_v32  ;;  %v1711_v42 = vsel %vm1709_vm4, %v1678_v36, %v2938_v31  ;;  %3240 = vrot.lane.b32.xlu0 %v3199_v51, %s3659_s15  ;;  %v4240_v31 = vpack.i.bf16 %v4228_v13, %v4226_v12 }
 0x10b   : > { %v2946_v50 = vpop.permute.xlu1 %2945  ;;  %v1743_v51 = vsel %vm1742_vm5, %v1710_v41, %v2942_v40  ;;  %v1744_v61 = vsel %vm1742_vm5, %v1711_v42, %v2943_v1 }
 0x10c   : > { %v2948_v54 = vunpack.i.h.bf16 %v2946_v50  ;;  %v2947_v58 = vunpack.i.l.bf16 %v2946_v50  ;;  %v2961_v59 = vpop.permute.xlu0 %2960 }
 0x10d   : > { %3235 = vrot.lane.b32.xlu1 %v4203_v34, %s3663_s14  ;;  %v2963_v22 = vunpack.i.h.bf16 %v2961_v59  ;;  %v2962_v18 = vunpack.i.l.bf16 %v2961_v59 }
 0x10e   : > { %3250 = vrot.lane.b32.xlu0 %v4187_v56, %s3661_s28  ;;  %v1776_v3 = vsel %vm1775_vm6, %v1743_v51, %v2947_v58  ;;  %v1777_v7 = vsel %vm1775_vm6, %v1744_v61, %v2948_v54 }
 0x10f   : > { %v2956_v8 = vpop.permute.xlu1 %2955  ;;  %v1809_v9 = vsel %vm1808_vm7, %v1776_v3, %v2952_v49  ;;  %v1810_v10 = vsel %vm1808_vm7, %v1777_v7, %v2953_v48 }
 0x110   : > { %v2958_v14 = vunpack.i.h.bf16 %v2956_v8  ;;  %v2957_v15 = vunpack.i.l.bf16 %v2956_v8  ;;  %v2971_v16 = vpop.permute.xlu0 %2970  ;;  %v1841_v20 = vpack.c.bf16 %v1810_v10, %v1809_v9  ;;  %v4270_v9 = vld [vmem:[#allocation2 + $0x122] sm:$0xff]  ;;  %v4272_v10 = vld [vmem:[#allocation2 + $0x12a] sm:$0xff] }
 0x111   : > { %3245 = vrot.lane.b32.xlu1 %v4214_v60, %s3662_s13  ;;  %v2973_v36 = vunpack.i.h.bf16 %v2971_v16  ;;  %v2972_v1 = vunpack.i.l.bf16 %v2971_v16 }
 0x112   : > { %v1613_v25 = vsel %vm273_vm0, %v4036_v44, %v2957_v15  ;;  %v1614_v30 = vsel %vm273_vm0, %v4038_v45, %v2958_v14  ;;  %3260 = vrot.lane.b32.xlu0 %v4220_v62, %s3660_s16  ;;  %2026 = vmatmul.mubr.bf16.vlgmr.msra.gmra.mrb[0].mxu0 %v1841_v20 }
 0x113   : > { %v2966_v32 = vpop.permute.xlu1 %2965  ;;  %2639 = vmatprep.mubr.msk.bf16.mxu0 %vm273_vm0, %v1844_v6  ;;  %v1646_v45 = vsel %vm1643_vm2, %v1613_v25, %v2962_v18  ;;  %v1647_v40 = vsel %vm1643_vm2, %v1614_v30, %v2963_v22  ;;  %v4282_v30 = vpack.i.bf16 %v4272_v10, %v4270_v9 }
 0x114   : > { %v2968_v33 = vunpack.i.h.bf16 %v2966_v32  ;;  %v2967_v35 = vunpack.i.l.bf16 %v2966_v32  ;;  %v2981_v44 = vpop.permute.xlu0 %2980  ;;  %v641_v32 = vld [vmem:[#allocation2 + $0x138] sm:$0xff] }
 0x115   : > { %3255 = vrot.lane.b32.xlu1 %v4178_v47, %s3657_s24  ;;  %v2983_v46 = vunpack.i.h.bf16 %v2981_v44  ;;  %v2982_v48 = vunpack.i.l.bf16 %v2981_v44 }
 0x116   : > { %v1679_v41 = vsel %vm1676_vm3, %v1646_v45, %v2967_v35  ;;  %v1680_v42 = vsel %vm1676_vm3, %v1647_v40, %v2968_v33  ;;  %3270 = vrot.lane.b32.xlu0 %v4240_v31, %s3663_s14 }
 0x117   : > { %v2976_v4 = vpop.permute.xlu1 %2975  ;;  %v1712_v49 = vsel %vm1709_vm4, %v1679_v41, %v2972_v1  ;;  %v1713_v50 = vsel %vm1709_vm4, %v1680_v42, %v2973_v36 }
 0x118   : > { %v2978_v5 = vunpack.i.h.bf16 %v2976_v4  ;;  %v2977_v6 = vunpack.i.l.bf16 %v2976_v4  ;;  %v2991_v43 = vpop.permute.xlu0 %2990 }
 0x119   : > { %3265 = vrot.lane.b32.xlu1 %v4198_v19, %s3658_s26  ;;  %v2993_v53 = vunpack.i.h.bf16 %v2991_v43  ;;  %v2992_v54 = vunpack.i.l.bf16 %v2991_v43 }
 0x11a   : > { %v1745_v47 = vsel %vm1742_vm5, %v1712_v49, %v2977_v6  ;;  %v1746_v52 = vsel %vm1742_vm5, %v1713_v50, %v2978_v5  ;;  %3280 = vrot.lane.b32.xlu0 %v4153_v11, %s3662_s13 }
 0x11b   : > { %v2986_v58 = vpop.permute.xlu1 %2985  ;;  %v1778_v3 = vsel %vm1775_vm6, %v1745_v47, %v2982_v48  ;;  %v1779_v19 = vsel %vm1775_vm6, %v1746_v52, %v2983_v46  ;;  %v1616_v14 = vsel %vm273_vm0, %v4050_v57, %v2993_v53  ;;  %v642_v57 = vld [vmem:[#allocation2 + $0x140] sm:$0xff] }
 0x11c   : > { %v2988_v59 = vunpack.i.h.bf16 %v2986_v58  ;;  %v2987_v51 = vunpack.i.l.bf16 %v2986_v58  ;;  %v3001_v61 = vpop.permute.xlu0 %3000  ;;  %v4292_v45 = vpack.i.bf16 %v642_v57, %v641_v32 }
 0x11d   : > { %3275 = vrot.lane.b32.xlu1 %v4203_v34, %s3659_s15  ;;  %v1615_v34 = vsel %vm273_vm0, %v4047_v55, %v2992_v54  ;;  %v3002_v25 = vunpack.i.l.bf16 %v3001_v61 }
 0x11e   : > { %3290 = vrot.lane.b32.xlu0 %v4187_v56, %s3657_s24  ;;  %v1811_v7 = vsel %vm1808_vm7, %v1778_v3, %v2987_v51  ;;  %v1812_v8 = vsel %vm1808_vm7, %v1779_v19, %v2988_v59  ;;  %v3003_v56 = vunpack.i.h.bf16 %v3001_v61 }
 0x11f   : > { %v2996_v15 = vpop.permute.xlu1 %2995  ;;  %v1843_v16 = vpack.c.bf16 %v1812_v8, %v1811_v7 }
 0x120   : > { %v2998_v20 = vunpack.i.h.bf16 %v2996_v15  ;;  %v2997_v22 = vunpack.i.l.bf16 %v2996_v15  ;;  %v3011_v18 = vpop.permute.xlu0 %3010 }
 0x121   : > { %3285 = vrot.lane.b32.xlu1 %v4214_v60, %s3661_s28  ;;  %2034 = vmatmul.mubr.bf16.gmra.mrb[4].mxu0 %v1843_v16  ;;  %v3013_v40 = vunpack.i.h.bf16 %v3011_v18  ;;  %v3012_v41 = vunpack.i.l.bf16 %v3011_v18 }
 0x122   : > { %v1648_v33 = vsel %vm1643_vm2, %v1615_v34, %v2997_v22  ;;  %v1649_v55 = vsel %vm1643_vm2, %v1616_v14, %v2998_v20  ;;  %3300 = vrot.lane.b32.xlu0 %v4220_v62, %s3658_s26  ;;  %2640 = vmatprep.mubr.msk.bf16.mxu0 %vm273_vm0, %v1846_v26  ;;  %v674_v26 = vld [vmem:[#allocation2 + $0x141] sm:$0xff] }
 0x123   : > { %v3006_v35 = vpop.permute.xlu1 %3005  ;;  %v1681_v42 = vsel %vm1676_vm3, %v1648_v33, %v3002_v25  ;;  %v1682_v4 = vsel %vm1676_vm3, %v1649_v55, %v3003_v56  ;;  %v4306_v52 = vpack.i.bf16 %v674_v26, %v673_v24 }
 0x124   : > { %v3008_v44 = vunpack.i.h.bf16 %v3006_v35  ;;  %v3007_v36 = vunpack.i.l.bf16 %v3006_v35  ;;  %v3021_v1 = vpop.permute.xlu0 %3020 }
 0x125   : > { %3295 = vrot.lane.b32.xlu1 %v4282_v30, %s3660_s16  ;;  %v3023_v5 = vunpack.i.h.bf16 %v3021_v1  ;;  %v3022_v6 = vunpack.i.l.bf16 %v3021_v1  ;;  %v675_v1 = vld [vmem:[#allocation2 + $0x151] sm:$0xff] }
 0x126   : > { %v1714_v62 = vsel %vm1709_vm4, %v1681_v42, %v3007_v36  ;;  %v1715_v23 = vsel %vm1709_vm4, %v1682_v4, %v3008_v44  ;;  %3310 = vrot.lane.b32.xlu0 %v4240_v31, %s3659_s15  ;;  %v676_v4 = vld [vmem:[#allocation2 + $0x159] sm:$0xff] }
 0x127   : > { %v3016_v43 = vpop.permute.xlu1 %3015  ;;  %v1747_v50 = vsel %vm1742_vm5, %v1714_v62, %v3012_v41  ;;  %v1748_v47 = vsel %vm1742_vm5, %v1715_v23, %v3013_v40  ;;  %v691_v62 = vld [vmem:[#allocation2 + $0x92] sm:$0xff]  ;;  %v692_v23 = vld [vmem:[#allocation2 + $0x9a] sm:$0xff] }
 0x128   : > { %v3018_v46 = vunpack.i.h.bf16 %v3016_v43  ;;  %v3017_v48 = vunpack.i.l.bf16 %v3016_v43  ;;  %v3031_v49 = vpop.permute.xlu0 %3030 }
 0x129   : > { %3305 = vrot.lane.b32.xlu1 %v4292_v45, %s3663_s14  ;;  %v3033_v7 = vunpack.i.h.bf16 %v3031_v49  ;;  %v3032_v8 = vunpack.i.l.bf16 %v3031_v49  ;;  %v4355_v49 = vpack.i.bf16 %v676_v4, %v675_v1 }
 0x12a   : > { %v1780_v53 = vsel %vm1775_vm6, %v1747_v50, %v3017_v48  ;;  %v1781_v31 = vsel %vm1775_vm6, %v1748_v47, %v3018_v46  ;;  %3320 = vrot.lane.b32.xlu0 %v4153_v11, %s3661_s28  ;;  %v643_v46 = vld [vmem:[#allocation2 + $0x150] sm:$0xff]  ;;  %v644_v48 = vld [vmem:[#allocation2 + $0x158] sm:$0xff]  ;;  %v1850_v50 = vpack.c.bf16 %v692_v23, %v691_v62 }
 0x12b   : > { %v3026_v54 = vpop.permute.xlu1 %3025  ;;  %v1813_v58 = vsel %vm1808_vm7, %v1780_v53, %v3022_v6  ;;  %v1814_v59 = vsel %vm1808_vm7, %v1781_v31, %v3023_v5 }
 0x12c   : > { %v3028_v51 = vunpack.i.h.bf16 %v3026_v54  ;;  %v3027_v61 = vunpack.i.l.bf16 %v3026_v54  ;;  %v3041_v3 = vpop.permute.xlu0 %3040  ;;  %v1845_v19 = vpack.c.bf16 %v1814_v59, %v1813_v58 }
 0x12d   : > { %3315 = vrot.lane.b32.xlu1 %v4306_v52, %s3662_s13  ;;  %v3043_v22 = vunpack.i.h.bf16 %v3041_v3  ;;  %v3042_v18 = vunpack.i.l.bf16 %v3041_v3  ;;  %v3364_v3 = vpack.i.bf16 %v644_v48, %v643_v46  ;;  %v677_v48 = vld [vmem:[#allocation2 + $0x169] sm:$0xff] }
 0x12e   : > { %v1618_v14 = vsel %vm273_vm0, %v4065_v2, %v3028_v51  ;;  %v1617_v11 = vsel %vm273_vm0, %v4063_v63, %v3027_v61  ;;  %3330 = vrot.lane.b32.xlu0 %v4158_v17, %s3660_s16  ;;  %2042 = vmatmul.mubr.bf16.gmra.mrb[8].mxu0 %v1845_v19 }
 0x12f   : > { %v3036_v34 = vpop.permute.xlu1 %3035  ;;  %2641 = vmatprep.mubr.msk.bf16.mxu0 %vm273_vm0, %v1848_v39  ;;  %v1650_v2 = vsel %vm1643_vm2, %v1617_v11, %v3032_v8  ;;  %v1651_v56 = vsel %vm1643_vm2, %v1618_v14, %v3033_v7  ;;  %v4336_v39 = vld [vmem:[#allocation2 + $0x142] sm:$0xff] }
 0x130   : > { %v3038_v15 = vunpack.i.h.bf16 %v3036_v34  ;;  %v3037_v16 = vunpack.i.l.bf16 %v3036_v34  ;;  %v3051_v20 = vpop.permute.xlu0 %3050  ;;  %v3359_v36 = vpack.i.bf16 %v4336_v39, %v4334_v38 }
 0x131   : > { %3325 = vrot.lane.b32.xlu1 %v4214_v60, %s3657_s24  ;;  %v3053_v33 = vunpack.i.h.bf16 %v3051_v20  ;;  %v3052_v55 = vunpack.i.l.bf16 %v3051_v20 }
 0x132   : > { %v1683_v63 = vsel %vm1676_vm3, %v1650_v2, %v3037_v16  ;;  %v1684_v17 = vsel %vm1676_vm3, %v1651_v56, %v3038_v15  ;;  %3340 = vrot.lane.b32.xlu0 %v4163_v21, %s3663_s14 }
 0x133   : > { %v3046_v37 = vpop.permute.xlu1 %3045  ;;  %v1716_v35 = vsel %vm1709_vm4, %v1683_v63, %v3042_v18  ;;  %v1717_v60 = vsel %vm1709_vm4, %v1684_v17, %v3043_v22  ;;  %v4374_v63 = vld [vmem:[#allocation2 + $0x168] sm:$0xff]  ;;  %v4376_v17 = vld [vmem:[#allocation2 + $0x170] sm:$0xff] }
 0x134   : > { %v3048_v25 = vunpack.i.h.bf16 %v3046_v37  ;;  %v3047_v32 = vunpack.i.l.bf16 %v3046_v37  ;;  %v3061_v57 = vpop.permute.xlu0 %3060  ;;  %v3399_v1 = vpack.i.bf16 %v4376_v17, %v4374_v63 }
 0x135   : > { %3335 = vrot.lane.b32.xlu1 %v4282_v30, %s3658_s26  ;;  %v3063_v40 = vunpack.i.h.bf16 %v3061_v57  ;;  %v3062_v41 = vunpack.i.l.bf16 %v3061_v57  ;;  %v693_v57 = vld [vmem:[#allocation2 + $0xaa] sm:$0xff] }
 0x136   : > { %v1749_v44 = vsel %vm1742_vm5, %v1716_v35, %v3047_v32  ;;  %v1750_v21 = vsel %vm1742_vm5, %v1717_v60, %v3048_v25  ;;  %3350 = vrot.lane.b32.xlu0 %v4168_v27, %s3662_s13 }
 0x137   : > { %v3056_v42 = vpop.permute.xlu1 %3055  ;;  %v1782_v5 = vsel %vm1775_vm6, %v1749_v44, %v3052_v55  ;;  %v1783_v27 = vsel %vm1775_vm6, %v1750_v21, %v3053_v33  ;;  %v1620_v47 = vsel %vm273_vm0, %v4106_v29, %v3063_v40  ;;  %v694_v33 = vld [vmem:[#allocation2 + $0xb2] sm:$0xff] }
 0x138   : > { %v3058_v24 = vunpack.i.h.bf16 %v3056_v42  ;;  %v3057_v26 = vunpack.i.l.bf16 %v3056_v42  ;;  %v3071_v30 = vpop.permute.xlu0 %3070  ;;  %v4386_v21 = vld [vmem:[#allocation2 + $0x152] sm:$0xff]  ;;  %v1852_v62 = vpack.c.bf16 %v694_v33, %v693_v57  ;;  %v696_v57 = vld [vmem:[#allocation2 + $0xca] sm:$0xff] }
 0x139   : > { %3345 = vrot.lane.b32.xlu1 %v4292_v45, %s3659_s15  ;;  %v1619_v45 = vsel %vm273_vm0, %v4104_v28, %v3062_v41  ;;  %v3073_v51 = vunpack.i.h.bf16 %v3071_v30  ;;  %v3072_v61 = vunpack.i.l.bf16 %v3071_v30  ;;  %v436_v40 = vld [vmem:[#allocation2 + $0x78] sm:$0xff]  ;;  %v437_v41 = vld [vmem:[#allocation2 + $0x80] sm:$0xff] }
 0x13a   : > { %v1815_v6 = vsel %vm1808_vm7, %v1782_v5, %v3057_v26  ;;  %v1816_v43 = vsel %vm1808_vm7, %v1783_v27, %v3058_v24  ;;  %3360 = vrot.lane.b32.xlu0 %v3359_v36, %s3660_s16 }
 0x13b   : > { %v3066_v53 = vpop.permute.xlu1 %3065  ;;  %v1847_v31 = vpack.c.bf16 %v1816_v43, %v1815_v6 }
 0x13c   : > { %v3068_v54 = vunpack.i.h.bf16 %v3066_v53  ;;  %v3067_v58 = vunpack.i.l.bf16 %v3066_v53  ;;  %v3081_v59 = vpop.permute.xlu0 %3080 }
 0x13d   : > { %3355 = vrot.lane.b32.xlu1 %v4306_v52, %s3661_s28  ;;  %2050 = vmatmul.mubr.bf16.gmra.mrb[12].mxu0 %v1847_v31  ;;  %v3083_v11 = vunpack.i.h.bf16 %v3081_v59  ;;  %v3082_v34 = vunpack.i.l.bf16 %v3081_v59 }
 0x13e   : > { %v1652_v19 = vsel %vm1643_vm2, %v1619_v45, %v3067_v58  ;;  %v1653_v7 = vsel %vm1643_vm2, %v1620_v47, %v3068_v54  ;;  %3370 = vrot.lane.b32.xlu0 %v4355_v49, %s3662_s13  ;;  %2642 = vmatprep.mubr.msk.bf16.mxu0 %vm273_vm0, %v1850_v50  ;;  %v678_v50 = vld [vmem:[#allocation2 + $0x171] sm:$0xff] }
 0x13f   : > { %v3076_v28 = vpop.permute.xlu1 %3075  ;;  %v1685_v15 = vsel %vm1676_vm3, %v1652_v19, %v3072_v61  ;;  %v1686_v16 = vsel %vm1676_vm3, %v1653_v7, %v3073_v51  ;;  %v3404_v61 = vpack.i.bf16 %v678_v50, %v677_v48  ;;  %v649_v48 = vld [vmem:[#allocation2 + $0x198] sm:$0xff]  ;;  %v650_v50 = vld [vmem:[#allocation2 + $0x1a0] sm:$0xff] }
 0x140   : > { %v3078_v29 = vunpack.i.h.bf16 %v3076_v28  ;;  %v3077_v8 = vunpack.i.l.bf16 %v3076_v28  ;;  %v3091_v14 = vpop.permute.xlu0 %3090 }
 0x141   : > { %3365 = vrot.lane.b32.xlu1 %v3364_v3, %s3663_s14  ;;  %v3093_v18 = vunpack.i.h.bf16 %v3091_v14  ;;  %v3092_v2 = vunpack.i.l.bf16 %v3091_v14  ;;  %v4410_v14 = vld [vmem:[#allocation2 + $0x172] sm:$0xff] }
 0x142   : > { %v1718_v20 = vsel %vm1709_vm4, %v1685_v15, %v3077_v8  ;;  %v1719_v22 = vsel %vm1709_vm4, %v1686_v16, %v3078_v29  ;;  %3380 = vrot.lane.b32.xlu0 %v3359_v36, %s3658_s26  ;;  %v4388_v36 = vld [vmem:[#allocation2 + $0x15a] sm:$0xff]  ;;  %v4408_v8 = vld [vmem:[#allocation2 + $0x16a] sm:$0xff] }
 0x143   : > { %v3086_v56 = vpop.permute.xlu1 %3085  ;;  %v1751_v55 = vsel %vm1742_vm5, %v1718_v20, %v3082_v34  ;;  %v1752_v35 = vsel %vm1742_vm5, %v1719_v22, %v3083_v11  ;;  %v3394_v6 = vpack.i.bf16 %v4388_v36, %v4386_v21 }
 0x144   : > { %v3088_v37 = vunpack.i.h.bf16 %v3086_v56  ;;  %v3087_v25 = vunpack.i.l.bf16 %v3086_v56  ;;  %v3101_v32 = vpop.permute.xlu0 %3100  ;;  %v679_v56 = vld [vmem:[#allocation2 + $0x181] sm:$0xff] }
 0x145   : > { %3375 = vrot.lane.b32.xlu1 %v4306_v52, %s3657_s24  ;;  %v3103_v5 = vunpack.i.h.bf16 %v3101_v32  ;;  %v3102_v27 = vunpack.i.l.bf16 %v3101_v32  ;;  %v695_v32 = vld [vmem:[#allocation2 + $0xc2] sm:$0xff] }
 0x146   : > { %v1784_v60 = vsel %vm1775_vm6, %v1751_v55, %v3087_v25  ;;  %v1785_v44 = vsel %vm1775_vm6, %v1752_v35, %v3088_v37  ;;  %3390 = vrot.lane.b32.xlu0 %v4355_v49, %s3661_s28  ;;  %v680_v37 = vld [vmem:[#allocation2 + $0x189] sm:$0xff] }
 0x147   : > { %v3096_v42 = vpop.permute.xlu1 %3095  ;;  %v1817_v4 = vsel %vm1808_vm7, %v1784_v60, %v3092_v2  ;;  %v1818_v52 = vsel %vm1808_vm7, %v1785_v44, %v3093_v18  ;;  %v647_v44 = vld [vmem:[#allocation2 + $0x180] sm:$0xff] }
 0x148   : > { %v3098_v23 = vunpack.i.h.bf16 %v3096_v42  ;;  %v3097_v24 = vunpack.i.l.bf16 %v3096_v42  ;;  %v3111_v26 = vpop.permute.xlu0 %3110  ;;  %v1849_v30 = vpack.c.bf16 %v1818_v52, %v1817_v4  ;;  %v1854_v52 = vpack.c.bf16 %v696_v57, %v695_v32 }
 0x149   : > { %3385 = vrot.lane.b32.xlu1 %v3364_v3, %s3659_s15  ;;  %v3113_v45 = vunpack.i.h.bf16 %v3111_v26  ;;  %v3112_v53 = vunpack.i.l.bf16 %v3111_v26 }
 0x14a   : > { %v1622_v43 = vsel %vm273_vm0, %v437_v41, %v3098_v23  ;;  %v1621_v46 = vsel %vm273_vm0, %v436_v40, %v3097_v24  ;;  %2058 = vmatmul.mubr.bf16.gmra.mrb[16].mxu0 %v1849_v30  ;;  %3400 = vrot.lane.b32.xlu0 %v3399_v1, %s3663_s14  ;;  %v3439_v40 = vpack.i.bf16 %v680_v37, %v679_v56  ;;  %v438_v56 = vld [vmem:[#allocation2 + $0x90] sm:$0xff]  ;;  %v439_v37 = vld [vmem:[#allocation2 + $0x98] sm:$0xff] }
 0x14b   : > { %v3106_v47 = vpop.permute.xlu1 %3105  ;;  %2643 = vmatprep.mubr.msk.bf16.mxu0 %vm273_vm0, %v1852_v62  ;;  %v1654_v59 = vsel %vm1643_vm2, %v1621_v46, %v3102_v27  ;;  %v1655_v51 = vsel %vm1643_vm2, %v1622_v43, %v3103_v5  ;;  %v4435_v5 = vld [vmem:[#allocation2 + $0x182] sm:$0xff]  ;;  %v4437_v46 = vld [vmem:[#allocation2 + $0x18a] sm:$0xff] }
 0x14c   : > { %v3108_v31 = vunpack.i.h.bf16 %v3106_v47  ;;  %v3107_v54 = vunpack.i.l.bf16 %v3106_v47  ;;  %v3121_v58 = vpop.permute.xlu0 %3120 }
 0x14d   : > { %3395 = vrot.lane.b32.xlu1 %v3394_v6, %s3660_s16  ;;  %v3123_v7 = vunpack.i.h.bf16 %v3121_v58  ;;  %v3122_v28 = vunpack.i.l.bf16 %v3121_v58  ;;  %v3464_v58 = vpack.i.bf16 %v4437_v46, %v4435_v5 }
 0x14e   : > { %v1687_v3 = vsel %vm1676_vm3, %v1654_v59, %v3107_v54  ;;  %v1688_v19 = vsel %vm1676_vm3, %v1655_v51, %v3108_v31  ;;  %3410 = vrot.lane.b32.xlu0 %v4355_v49, %s3657_s24  ;;  %v3429_v49 = vpack.i.bf16 %v4410_v14, %v4408_v8  ;;  %v3469_v59 = vpack.i.bf16 %v650_v50, %v649_v48 }
 0x14f   : > { %v3116_v29 = vpop.permute.xlu1 %3115  ;;  %v1720_v11 = vsel %vm1709_vm4, %v1687_v3, %v3112_v53  ;;  %v1721_v34 = vsel %vm1709_vm4, %v1688_v19, %v3113_v45 }
 0x150   : > { %v3131_v15 = vpop.permute.xlu0 %3130  ;;  %v1753_v22 = vsel %vm1742_vm5, %v1720_v11, %v3122_v28  ;;  %v1754_v18 = vsel %vm1742_vm5, %v1721_v34, %v3123_v7  ;;  %v3118_v27 = vunpack.i.h.bf16 %v3116_v29  ;;  %v682_v11 = vld [vmem:[#allocation2 + $0x1a1] sm:$0xff] }
 0x151   : > { %3405 = vrot.lane.b32.xlu1 %v3404_v61, %s3662_s13  ;;  %v3133_v16 = vunpack.i.h.bf16 %v3131_v15  ;;  %v3132_v20 = vunpack.i.l.bf16 %v3131_v15 }
 0x152   : > { %3420 = vrot.lane.b32.xlu0 %v3399_v1, %s3659_s15  ;;  %v648_v1 = vld [vmem:[#allocation2 + $0x188] sm:$0xff]  ;;  %v1630_v51 = vsel %vm273_vm0, %v4228_v13, %v3118_v27 }
 0x153   : > { %v3126_v2 = vpop.permute.xlu1 %3125  ;;  %v1786_v35 = vsel %vm1775_vm6, %v1753_v22, %v3132_v20  ;;  %v1787_v60 = vsel %vm1775_vm6, %v1754_v18, %v3133_v16  ;;  %v3434_v24 = vpack.i.bf16 %v648_v1, %v647_v44 }
 0x154   : > { %v3141_v25 = vpop.permute.xlu0 %3140  ;;  %v3128_v47 = vunpack.i.h.bf16 %v3126_v2  ;;  %v3127_v45 = vunpack.i.l.bf16 %v3126_v2 }
 0x155   : > { %v3143_v33 = vunpack.i.h.bf16 %v3141_v25  ;;  %v3142_v55 = vunpack.i.l.bf16 %v3141_v25  ;;  %3415 = vrot.lane.b32.xlu1 %v3394_v6, %s3658_s26  ;;  %v3117_v6 = vunpack.i.l.bf16 %v3116_v29  ;;  %v681_v29 = vld [vmem:[#allocation2 + $0x199] sm:$0xff] }
 0x156   : > { %3430 = vrot.lane.b32.xlu0 %v3429_v49, %s3660_s16  ;;  %v1663_v34 = vsel %vm1643_vm2, %v1630_v51, %v3128_v47  ;;  %v3474_v25 = vpack.i.bf16 %v682_v11, %v681_v29  ;;  %v698_v29 = vld [vmem:[#allocation2 + $0xe2] sm:$0xff] }
 0x157   : > { %v3136_v41 = vpop.permute.xlu1 %3135  ;;  %v1819_v42 = vsel %vm1808_vm7, %v1786_v35, %v3142_v55  ;;  %v1820_v4 = vsel %vm1808_vm7, %v1787_v60, %v3143_v33  ;;  %v1629_v3 = vsel %vm273_vm0, %v4226_v12, %v3117_v6 }
 0x158   : > { %v4426_v62 = vpop.permute.xlu0 %3150  ;;  %v1851_v23 = vpack.c.bf16 %v1820_v4, %v1819_v42  ;;  %v3138_v31 = vunpack.i.h.bf16 %v3136_v41  ;;  %v3137_v54 = vunpack.i.l.bf16 %v3136_v41 }
 0x159   : > { %3425 = vrot.lane.b32.xlu1 %v3404_v61, %s3661_s28  ;;  %v3152_v22 = vunpack.i.l.bf16 %v4426_v62 }
 0x15a   : > { %2066 = vmatmul.mubr.bf16.gmra.mrb[20].mxu0 %v1851_v23  ;;  %3440 = vrot.lane.b32.xlu0 %v3439_v40, %s3662_s13  ;;  %v1696_v2 = vsel %vm1676_vm3, %v1663_v34, %v3138_v31 }
 0x15b   : > { %v3146_v26 = vpop.permute.xlu1 %3145  ;;  %2644 = vmatprep.mubr.msk.bf16.mxu0 %vm273_vm0, %v1854_v52  ;;  %v1623_v4 = vsel %vm273_vm0, %v438_v56, %v3152_v22 }
 0x15c   : > { %v4431_v30 = vpop.permute.xlu0 %3160  ;;  %v3148_v19 = vunpack.i.h.bf16 %v3146_v26  ;;  %v3147_v7 = vunpack.i.l.bf16 %v3146_v26  ;;  %v1862_v26 = vpack.c.bf16 %v4272_v10, %v4270_v9 }
 0x15d   : > { %3435 = vrot.lane.b32.xlu1 %v3434_v24, %s3663_s14  ;;  %v3163_v33 = vunpack.i.h.bf16 %v4431_v30  ;;  %v3162_v55 = vunpack.i.l.bf16 %v4431_v30 }
 0x15e   : > { %3450 = vrot.lane.b32.xlu0 %v3429_v49, %s3658_s26  ;;  %v3153_v49 = vunpack.i.h.bf16 %v4426_v62  ;;  %v1729_v57 = vsel %vm1709_vm4, %v1696_v2, %v3148_v19  ;;  %s4887_s26 = scalar_lea.hbm %s4952_s5, %s2661_s10 }
 0x15f   : > { %v3156_v43 = vpop.permute.xlu1 %3155  ;;  %v1656_v48 = vsel %vm1643_vm2, %v1623_v4, %v3162_v55  ;;  %v447_v55 = vld [vmem:[#allocation2 + $0xf8] sm:$0xff] }
 0x160   : > { %v4439_v53 = vpop.permute.xlu0 %3170  ;;  %v3158_v15 = vunpack.i.h.bf16 %v3156_v43  ;;  %v3157_v16 = vunpack.i.l.bf16 %v3156_v43  ;;  %v1624_v42 = vsel %vm273_vm0, %v439_v37, %v3153_v49 }
 0x161   : > { %3445 = vrot.lane.b32.xlu1 %v3404_v61, %s3657_s24  ;;  %v1662_v61 = vsel %vm1643_vm2, %v1629_v3, %v3127_v45  ;;  %v3173_v30 = vunpack.i.h.bf16 %v4439_v53  ;;  %v3172_v27 = vunpack.i.l.bf16 %v4439_v53  ;;  %v1657_v50 = vsel %vm1643_vm2, %v1624_v42, %v3163_v33  ;;  %v446_v33 = vld [vmem:[#allocation2 + $0xf0] sm:$0xff] }
 0x162   : > { %3460 = vrot.lane.b32.xlu0 %v3439_v40, %s3661_s28  ;;  %v1695_v12 = vsel %vm1676_vm3, %v1662_v61, %v3137_v54  ;;  %v1762_v44 = vsel %vm1742_vm5, %v1729_v57, %v3158_v15  ;;  %s3666_s28 = smov [#allocation9]  }
 0x163   : > { %v3166_v28 = vpop.permute.xlu1 %3165  ;;  %v1728_v32 = vsel %vm1709_vm4, %v1695_v12, %v3147_v7  ;;  %v1689_v10 = vsel %vm1676_vm3, %v1656_v48, %v3172_v27  ;;  %v1690_v53 = vsel %vm1676_vm3, %v1657_v50, %v3173_v30 }
 0x164   : > { %v3181_v20 = vpop.permute.xlu0 %3180  ;;  %v3168_v13 = vunpack.i.h.bf16 %v3166_v28  ;;  %v3167_v18 = vunpack.i.l.bf16 %v3166_v28  ;;  %v1761_v60 = vsel %vm1742_vm5, %v1728_v32, %v3157_v16  ;;  %v697_v28 = vld [vmem:[#allocation2 + $0xda] sm:$0xff] }
 0x165   : > { %3455 = vrot.lane.b32.xlu1 %v3434_v24, %s3659_s15  ;;  %v3183_v47 = vunpack.i.h.bf16 %v3181_v20  ;;  %v3182_v45 = vunpack.i.l.bf16 %v3181_v20  ;;  %s2511_s15 = scalar_lea.sflag [#allocation5], %s3877_s27 }
 0x166   : > { %3470 = vrot.lane.b32.xlu0 %v3469_v59, %s3663_s14  ;;  %v1794_v52 = vsel %vm1775_vm6, %v1761_v60, %v3167_v18  ;;  %v1795_v62 = vsel %vm1775_vm6, %v1762_v44, %v3168_v13  ;;  %v1856_v18 = vpack.c.bf16 %v698_v29, %v697_v28 }
 0x167   : > { %v3176_v35 = vpop.permute.xlu1 %3175  ;;  %v1722_v3 = vsel %vm1709_vm4, %v1689_v10, %v3182_v45  ;;  %v1723_v19 = vsel %vm1709_vm4, %v1690_v53, %v3183_v47 }
 0x168   : > { %v3178_v1 = vunpack.i.h.bf16 %v3176_v35  ;;  %v3177_v40 = vunpack.i.l.bf16 %v3176_v35  ;;  %v3191_v41 = vpop.permute.xlu0 %3190 }
 0x169   : > { %3465 = vrot.lane.b32.xlu1 %v3464_v58, %s3660_s16  ;;  %v3193_v54 = vunpack.i.h.bf16 %v3191_v41  ;;  %v3192_v58 = vunpack.i.l.bf16 %v3191_v41  ;;  %s3576_s16 = scalar_lea.vmem %s4889_s11, 4096 }
 0x16a   : > { %v1827_v23 = vsel %vm1808_vm7, %v1794_v52, %v3177_v40  ;;  %v1828_v24 = vsel %vm1808_vm7, %v1795_v62, %v3178_v1  ;;  %p3577_p11 = scmp.ne.s32.totalorder %s4889_s11, %s3576_s16 }
 0x16b   : > { %v3186_v6 = vpop.permute.xlu1 %3185  ;;  %v1859_v43 = vpack.c.bf16 %v1828_v24, %v1827_v23  ;;  %v1755_v11 = vsel %vm1742_vm5, %v1722_v3, %v3192_v58  ;;  %v1756_v61 = vsel %vm1742_vm5, %v1723_v19, %v3193_v54  ;;  %v441_v54 = vld [vmem:[#allocation2 + $0xb0] sm:$0xff] }
 0x16c   : > { %v3201_v31 = vpop.permute.xlu0 %3200  ;;  %v3187_v32 = vunpack.i.l.bf16 %v3186_v6  ;;  %p3578_p2 = pnand %p3577_p11, %p4966_p0 }
 0x16d   : > { %3475 = vrot.lane.b32.xlu1 %v3474_v25, %s3662_s13  ;;  %2098 = vmatmul.mubr.bf16.vlgmr.msra.gmra.mrb[0].mxu1 %v1859_v43  ;;  %v3203_v59 = vunpack.i.h.bf16 %v3201_v31  ;;  %v3202_v9 = vunpack.i.l.bf16 %v3201_v31  ;;  %v3188_v25 = vunpack.i.h.bf16 %v3186_v6  ;;  %v440_v31 = vld [vmem:[#allocation2 + $0xa8] sm:$0xff]  ;;  %s3580_s13 = sshll.u32 %s3666_s28, 4  ;;  %s3581_s13 = int_to_ptr.vmem [resolvable:$false] %s3580_s13 }
 0x16e   : > { %2648 = vmatprep.mubr.msk.bf16.mxu1 %vm273_vm0, %v1862_v26  ;;  %v1631_v42 = vsel %vm273_vm0, %v446_v33, %v3187_v32  ;;  %p3579_p3 = pneg %p3578_p2  ;;  %s3582_s14 = scalar_lea.vmem %s3581_s13, 8192 }
 0x16f   : > { %v3196_v51 = vpop.permute.xlu1 %3195  ;;  %v1788_v16 = vsel %vm1775_vm6, %v1755_v11, %v3202_v9  ;;  %v1789_v20 = vsel %vm1775_vm6, %v1756_v61, %v3203_v59  ;;  %v1632_v41 = vsel %vm273_vm0, %v447_v55, %v3188_v25  ;;  %p3583_p5 = scmp.lt.s32.totalorder %s4889_s11, %s3581_s13  ;;  %p3584_p9 = scmp.lt.s32.totalorder %s3582_s14, %s3576_s16 }
 0x170   : > { %v3211_v7 = vpop.permute.xlu0 %3210  ;;  %v3198_v35 = vunpack.i.h.bf16 %v3196_v51  ;;  %v3197_v60 = vunpack.i.l.bf16 %v3196_v51 }
 0x171   : > { %v3213_v34 = vunpack.i.h.bf16 %v3211_v7  ;;  %v3212_v15 = vunpack.i.l.bf16 %v3211_v7  ;;  %p3585_p12 = por %p3584_p9, %p3583_p5 }
 0x172   : > { %v1664_v23 = vsel %vm1643_vm2, %v1631_v42, %v3197_v60  ;;  %v1665_v24 = vsel %vm1643_vm2, %v1632_v41, %v3198_v35  ;;  %v700_v41 = vld [vmem:[#allocation2 + $0xfa] sm:$0xff] }
 0x173   : > { %v3206_v49 = vpop.permute.xlu1 %3205  ;;  %v1821_v22 = vsel %vm1808_vm7, %v1788_v16, %v3212_v15  ;;  %v1822_v13 = vsel %vm1808_vm7, %v1789_v20, %v3213_v34  ;;  %v1864_v20 = vpack.c.bf16 %v4336_v39, %v4334_v38  ;;  %p3586_p1 = pnand %p3585_p12, %p3579_p3 }
 0x174   : > { %v3221_v12 = vpop.permute.xlu0 %3220  ;;  %v1853_v2 = vpack.c.bf16 %v1822_v13, %v1821_v22  ;;  %v3208_v1 = vunpack.i.h.bf16 %v3206_v49  ;;  %v3207_v40 = vunpack.i.l.bf16 %v3206_v49 }
 0x175   : > { %v3223_v6 = vunpack.i.h.bf16 %v3221_v12  ;;  %v3222_v43 = vunpack.i.l.bf16 %v3221_v12 }
 0x176   : > { %2074 = vmatmul.mubr.bf16.gmra.mrb[24].mxu0 %v1853_v2  ;;  %v1697_v47 = vsel %vm1676_vm3, %v1664_v23, %v3207_v40  ;;  %v1698_v45 = vsel %vm1676_vm3, %v1665_v24, %v3208_v1  ;;  %v699_v40 = vld [vmem:[#allocation2 + $0xf2] sm:$0xff] }
 0x177   : > { %v3216_v56 = vpop.permute.xlu1 %3215  ;;  %2645 = vmatprep.mubr.msk.bf16.mxu0 %vm273_vm0, %v1856_v18  ;;  %v1626_v29 = vsel %vm273_vm0, %v441_v54, %v3223_v6  ;;  %v1625_v11 = vsel %vm273_vm0, %v440_v31, %v3222_v43  ;;  %v1858_v6 = vpack.c.bf16 %v700_v41, %v699_v40 }
 0x178   : > { %v3231_v37 = vpop.permute.xlu0 %3230  ;;  %v3218_v4 = vunpack.i.h.bf16 %v3216_v56  ;;  %v3217_v52 = vunpack.i.l.bf16 %v3216_v56 }
 0x179   : > { %v3233_v9 = vunpack.i.h.bf16 %v3231_v37  ;;  %v3232_v10 = vunpack.i.l.bf16 %v3231_v37 }
 0x17a   : > { %v1730_v58 = vsel %vm1709_vm4, %v1697_v47, %v3217_v52  ;;  %v1731_v59 = vsel %vm1709_vm4, %v1698_v45, %v3218_v4 }
 0x17b   : > { %v3226_v57 = vpop.permute.xlu1 %3225  ;;  %v1658_v12 = vsel %vm1643_vm2, %v1625_v11, %v3232_v10  ;;  %v1659_v2 = vsel %vm1643_vm2, %v1626_v29, %v3233_v9 }
 0x17c   : > { %v3241_v44 = vpop.permute.xlu0 %3240  ;;  %v3228_v26 = vunpack.i.h.bf16 %v3226_v57  ;;  %v3227_v30 = vunpack.i.l.bf16 %v3226_v57 }
 0x17d   : > { %v3243_v49 = vunpack.i.h.bf16 %v3241_v44  ;;  %v3242_v22 = vunpack.i.l.bf16 %v3241_v44 }
 0x17e   : > { %v1763_v51 = vsel %vm1742_vm5, %v1730_v58, %v3227_v30  ;;  %v1764_v3 = vsel %vm1742_vm5, %v1731_v59, %v3228_v26  ;;  %v448_v58 = vld [vmem:[#allocation2 + $0x108] sm:$0xff]  ;;  %v449_v59 = vld [vmem:[#allocation2 + $0x110] sm:$0xff] }
 0x17f   : > { %v3236_v62 = vpop.permute.xlu1 %3235  ;;  %v1691_v38 = vsel %vm1676_vm3, %v1658_v12, %v3242_v22  ;;  %v1692_v39 = vsel %vm1676_vm3, %v1659_v2, %v3243_v49 }
 0x180   : > { %v3251_v27 = vpop.permute.xlu0 %3250  ;;  %v3238_v48 = vunpack.i.h.bf16 %v3236_v62  ;;  %v3237_v50 = vunpack.i.l.bf16 %v3236_v62 }
 0x181   : > { %v3253_v56 = vunpack.i.h.bf16 %v3251_v27  ;;  %v3252_v37 = vunpack.i.l.bf16 %v3251_v27 }
 0x182   : > { %v1796_v61 = vsel %vm1775_vm6, %v1763_v51, %v3237_v50  ;;  %v1797_v34 = vsel %vm1775_vm6, %v1764_v3, %v3238_v48 }
 0x183   : > { %v3246_v53 = vpop.permute.xlu1 %3245  ;;  %v1724_v60 = vsel %vm1709_vm4, %v1691_v38, %v3252_v37  ;;  %v1725_v44 = vsel %vm1709_vm4, %v1692_v39, %v3253_v56  ;;  %v442_v56 = vld [vmem:[#allocation2 + $0xc0] sm:$0xff]  ;;  %v443_v37 = vld [vmem:[#allocation2 + $0xc8] sm:$0xff] }
 0x184   : > { %v3248_v19 = vunpack.i.h.bf16 %v3246_v53  ;;  %v3247_v7 = vunpack.i.l.bf16 %v3246_v53  ;;  %v3261_v28 = vpop.permute.xlu0 %3260 }
 0x185   : > { %v3263_v32 = vunpack.i.h.bf16 %v3261_v28  ;;  %v3262_v57 = vunpack.i.l.bf16 %v3261_v28 }
 0x186   : > { %v1829_v15 = vsel %vm1808_vm7, %v1796_v61, %v3247_v7  ;;  %v1830_v16 = vsel %vm1808_vm7, %v1797_v34, %v3248_v19 }
 0x187   : > { %v3256_v13 = vpop.permute.xlu1 %3255  ;;  %v1861_v18 = vpack.c.bf16 %v1830_v16, %v1829_v15  ;;  %v1757_v42 = vsel %vm1742_vm5, %v1724_v60, %v3262_v57  ;;  %v1758_v4 = vsel %vm1742_vm5, %v1725_v44, %v3263_v32 }
 0x188   : > { %v3271_v25 = vpop.permute.xlu0 %3270  ;;  %v3258_v45 = vunpack.i.h.bf16 %v3256_v13  ;;  %v3257_v31 = vunpack.i.l.bf16 %v3256_v13 }
 0x189   : > { %2106 = vmatmul.mubr.bf16.gmra.mrb[4].mxu1 %v1861_v18  ;;  %v3273_v33 = vunpack.i.h.bf16 %v3271_v25  ;;  %v3272_v55 = vunpack.i.l.bf16 %v3271_v25 }
 0x18a   : > { %2649 = vmatprep.mubr.msk.bf16.mxu1 %vm273_vm0, %v1864_v20  ;;  %v1634_v19 = vsel %vm273_vm0, %v449_v59, %v3258_v45  ;;  %v1633_v7 = vsel %vm273_vm0, %v448_v58, %v3257_v31 }
 0x18b   : > { %v3266_v35 = vpop.permute.xlu1 %3265  ;;  %v1790_v23 = vsel %vm1775_vm6, %v1757_v42, %v3272_v55  ;;  %v1791_v24 = vsel %vm1775_vm6, %v1758_v4, %v3273_v33 }
 0x18c   : > { %v3281_v1 = vpop.permute.xlu0 %3280  ;;  %v3268_v9 = vunpack.i.h.bf16 %v3266_v35  ;;  %v3267_v10 = vunpack.i.l.bf16 %v3266_v35 }
 0x18d   : > { %v3283_v52 = vunpack.i.h.bf16 %v3281_v1  ;;  %v3282_v62 = vunpack.i.l.bf16 %v3281_v1 }
 0x18e   : > { %v1666_v61 = vsel %vm1643_vm2, %v1633_v7, %v3267_v10  ;;  %v1667_v34 = vsel %vm1643_vm2, %v1634_v19, %v3268_v9 }
 0x18f   : > { %v3276_v26 = vpop.permute.xlu1 %3275  ;;  %v1823_v30 = vsel %vm1808_vm7, %v1790_v23, %v3282_v62  ;;  %v1824_v27 = vsel %vm1808_vm7, %v1791_v24, %v3283_v52  ;;  %v1866_v62 = vpack.c.bf16 %v4388_v36, %v4386_v21 }
 0x190   : > { %v3291_v43 = vpop.permute.xlu0 %3290  ;;  %v1855_v48 = vpack.c.bf16 %v1824_v27, %v1823_v30  ;;  %v3278_v51 = vunpack.i.h.bf16 %v3276_v26  ;;  %v3277_v3 = vunpack.i.l.bf16 %v3276_v26 }
 0x191   : > { %v3293_v49 = vunpack.i.h.bf16 %v3291_v43  ;;  %v3292_v22 = vunpack.i.l.bf16 %v3291_v43 }
 0x192   : > { %2082 = vmatmul.mubr.bf16.gmra.mrb[28].mxu0 %v1855_v48  ;;  %v1699_v12 = vsel %vm1676_vm3, %v1666_v61, %v3277_v3  ;;  %v1700_v2 = vsel %vm1676_vm3, %v1667_v34, %v3278_v51 }
 0x193   : > { %v3286_v50 = vpop.permute.xlu1 %3285  ;;  %2646 = vmatprep.mubr.msk.bf16.mxu0 %vm273_vm0, %v1858_v6  ;;  %v1628_v1 = vsel %vm273_vm0, %v443_v37, %v3293_v49  ;;  %v1627_v40 = vsel %vm273_vm0, %v442_v56, %v3292_v22 }
 0x194   : > { %v3301_v47 = vpop.permute.xlu0 %3300  ;;  %v3288_v28 = vunpack.i.h.bf16 %v3286_v50  ;;  %v3287_v29 = vunpack.i.l.bf16 %v3286_v50 }
 0x195   : > { %v3303_v57 = vunpack.i.h.bf16 %v3301_v47  ;;  %v3302_v33 = vunpack.i.l.bf16 %v3301_v47 }
 0x196   : > { %v1732_v25 = vsel %vm1709_vm4, %v1699_v12, %v3287_v29  ;;  %v1733_v32 = vsel %vm1709_vm4, %v1700_v2, %v3288_v28 }
 0x197   : > { %v3296_v54 = vpop.permute.xlu1 %3295  ;;  %v1660_v27 = vsel %vm1643_vm2, %v1627_v40, %v3302_v33  ;;  %v1661_v6 = vsel %vm1643_vm2, %v1628_v1, %v3303_v57 }
 0x198   : > { %v3311_v53 = vpop.permute.xlu0 %3310  ;;  %v3298_v15 = vunpack.i.h.bf16 %v3296_v54  ;;  %v3297_v16 = vunpack.i.l.bf16 %v3296_v54 }
 0x199   : > { %v3313_v23 = vunpack.i.h.bf16 %v3311_v53  ;;  %v3312_v24 = vunpack.i.l.bf16 %v3311_v53 }
 0x19a   : > { %v1765_v38 = vsel %vm1742_vm5, %v1732_v25, %v3297_v16  ;;  %v1766_v39 = vsel %vm1742_vm5, %v1733_v32, %v3298_v15  ;;  %v450_v16 = vld [vmem:[#allocation2 + $0x120] sm:$0xff] }
 0x19b   : > { %v3306_v11 = vpop.permute.xlu1 %3305  ;;  %v1693_v21 = vsel %vm1676_vm3, %v1660_v27, %v3312_v24  ;;  %v1694_v36 = vsel %vm1676_vm3, %v1661_v6, %v3313_v23  ;;  %v452_v6 = vld [vmem:[#allocation2 + $0x138] sm:$0xff] }
 0x19c   : > { %v3321_v20 = vpop.permute.xlu0 %3320  ;;  %v3308_v13 = vunpack.i.h.bf16 %v3306_v11  ;;  %v3307_v18 = vunpack.i.l.bf16 %v3306_v11 }
 0x19d   : > { %v3323_v43 = vunpack.i.h.bf16 %v3321_v20  ;;  %v3322_v48 = vunpack.i.l.bf16 %v3321_v20  ;;  %v451_v20 = vld [vmem:[#allocation2 + $0x128] sm:$0xff] }
 0x19e   : > { %v1798_v41 = vsel %vm1775_vm6, %v1765_v38, %v3307_v18  ;;  %v1799_v42 = vsel %vm1775_vm6, %v1766_v39, %v3308_v13 }
 0x19f   : > { %v3316_v55 = vpop.permute.xlu1 %3315  ;;  %v1726_v59 = vsel %vm1709_vm4, %v1693_v21, %v3322_v48  ;;  %v1727_v9 = vsel %vm1709_vm4, %v1694_v36, %v3323_v43  ;;  %v453_v43 = vld [vmem:[#allocation2 + $0x140] sm:$0xff] }
 0x1a0   : > { %v3318_v35 = vunpack.i.h.bf16 %v3316_v55  ;;  %v3317_v60 = vunpack.i.l.bf16 %v3316_v55  ;;  %v3331_v44 = vpop.permute.xlu0 %3330 }
 0x1a1   : > { %v3333_v47 = vunpack.i.h.bf16 %v3331_v44  ;;  %v3332_v45 = vunpack.i.l.bf16 %v3331_v44 }
 0x1a2   : > { %v1831_v4 = vsel %vm1808_vm7, %v1798_v41, %v3317_v60  ;;  %v1832_v52 = vsel %vm1808_vm7, %v1799_v42, %v3318_v35 }
 0x1a3   : > { %v3326_v26 = vpop.permute.xlu1 %3325  ;;  %v1863_v30 = vpack.c.bf16 %v1832_v52, %v1831_v4  ;;  %v1759_v53 = vsel %vm1742_vm5, %v1726_v59, %v3332_v45  ;;  %v1760_v51 = vsel %vm1742_vm5, %v1727_v9, %v3333_v47  ;;  %v1868_v45 = vpack.c.bf16 %v4410_v14, %v4408_v8 }
 0x1a4   : > { %v3341_v50 = vpop.permute.xlu0 %3340  ;;  %v3328_v29 = vunpack.i.h.bf16 %v3326_v26  ;;  %v3327_v11 = vunpack.i.l.bf16 %v3326_v26 }
 0x1a5   : > { %2114 = vmatmul.mubr.bf16.gmra.mrb[8].mxu1 %v1863_v30  ;;  %v3343_v31 = vunpack.i.h.bf16 %v3341_v50  ;;  %v3342_v54 = vunpack.i.l.bf16 %v3341_v50 }
 0x1a6   : > { %2650 = vmatprep.mubr.msk.bf16.mxu1 %vm273_vm0, %v1866_v62  ;;  %v1636_v56 = vsel %vm273_vm0, %v451_v20, %v3328_v29  ;;  %v1635_v37 = vsel %vm273_vm0, %v450_v16, %v3327_v11 }
 0x1a7   : > { %v3336_v58 = vpop.permute.xlu1 %3335  ;;  %v1792_v7 = vsel %vm1775_vm6, %v1759_v53, %v3342_v54  ;;  %v1793_v28 = vsel %vm1775_vm6, %v1760_v51, %v3343_v31 }
 0x1a8   : > { %v3351_v10 = vpop.permute.xlu0 %3350  ;;  %v3338_v49 = vunpack.i.h.bf16 %v3336_v58  ;;  %v3337_v22 = vunpack.i.l.bf16 %v3336_v58 }
 0x1a9   : > { %v3353_v3 = vunpack.i.h.bf16 %v3351_v10  ;;  %v3352_v19 = vunpack.i.l.bf16 %v3351_v10 }
 0x1aa   : > { %v1668_v32 = vsel %vm1643_vm2, %v1635_v37, %v3337_v22  ;;  %v1669_v57 = vsel %vm1643_vm2, %v1636_v56, %v3338_v49 }
 0x1ab   : > { %v3346_v61 = vpop.permute.xlu1 %3345  ;;  %v1825_v34 = vsel %vm1808_vm7, %v1792_v7, %v3352_v19  ;;  %v1826_v15 = vsel %vm1808_vm7, %v1793_v28, %v3353_v3 }
 0x1ac   : > { %v1857_v13 = vpack.c.bf16 %v1826_v15, %v1825_v34  ;;  %v3361_v18 = vpop.permute.xlu0 %3360  ;;  %v3348_v12 = vunpack.i.h.bf16 %v3346_v61  ;;  %v3347_v2 = vunpack.i.l.bf16 %v3346_v61 }
 0x1ad   : > { %v3363_v60 = vunpack.i.h.bf16 %v3361_v18  ;;  %v3362_v44 = vunpack.i.l.bf16 %v3361_v18 }
 0x1ae   : > { %2090 = vmatmul.mubr.bf16.gmra.mrb[32].mxu0 %v1857_v13  ;;  %v1701_v39 = vsel %vm1676_vm3, %v1668_v32, %v3347_v2  ;;  %v1702_v35 = vsel %vm1676_vm3, %v1669_v57, %v3348_v12  ;;  %v454_v57 = vld [vmem:[#allocation2 + $0x150] sm:$0xff] }
 0x1af   : > { %v3356_v25 = vpop.permute.xlu1 %3355 }
 0x1b0   : > { %v3358_v33 = vunpack.i.h.bf16 %v3356_v25  ;;  %v3357_v55 = vunpack.i.l.bf16 %v3356_v25  ;;  %v3371_v38 = vpop.permute.xlu0 %3370 }
 0x1b1   : > { %v3373_v42 = vunpack.i.h.bf16 %v3371_v38  ;;  %v3372_v4 = vunpack.i.l.bf16 %v3371_v38 }
 0x1b2   : > { %v1734_v1 = vsel %vm1709_vm4, %v1701_v39, %v3357_v55  ;;  %v1735_v40 = vsel %vm1709_vm4, %v1702_v35, %v3358_v33  ;;  %v455_v33 = vld [vmem:[#allocation2 + $0x158] sm:$0xff] }
 0x1b3   : > { %v3366_v41 = vpop.permute.xlu1 %3365  ;;  %v1768_v24 = vsel %vm1742_vm5, %v1735_v40, %v3363_v60  ;;  %v1767_v26 = vsel %vm1742_vm5, %v1734_v1, %v3362_v44  ;;  %v1870_v44 = vpack.c.bf16 %v4437_v46, %v4435_v5 }
 0x1b4   : > { %v3368_v52 = vunpack.i.h.bf16 %v3366_v41  ;;  %v3367_v62 = vunpack.i.l.bf16 %v3366_v41  ;;  %v3381_v23 = vpop.permute.xlu0 %3380 }
 0x1b5   : > { %v3383_v58 = vunpack.i.h.bf16 %v3381_v23  ;;  %v3382_v59 = vunpack.i.l.bf16 %v3381_v23 }
 0x1b6   : > { %v1800_v30 = vsel %vm1775_vm6, %v1767_v26, %v3367_v62  ;;  %v1801_v27 = vsel %vm1775_vm6, %v1768_v24, %v3368_v52 }
 0x1b7   : > { %v3376_v48 = vpop.permute.xlu1 %3375  ;;  %v1833_v50 = vsel %vm1808_vm7, %v1800_v30, %v3372_v4  ;;  %v1834_v47 = vsel %vm1808_vm7, %v1801_v27, %v3373_v42 }
 0x1b8   : > { %v3378_v31 = vunpack.i.h.bf16 %v3376_v48  ;;  %v3377_v54 = vunpack.i.l.bf16 %v3376_v48  ;;  %v1865_v21 = vpack.c.bf16 %v1834_v47, %v1833_v50  ;;  %v3391_v36 = vpop.permute.xlu0 %3390 }
 0x1b9   : > { %v3393_v14 = vunpack.i.h.bf16 %v3391_v36  ;;  %v3392_v28 = vunpack.i.l.bf16 %v3391_v36 }
 0x1ba   : > { %v1638_v9 = vsel %vm273_vm0, %v453_v43, %v3378_v31  ;;  %v1637_v10 = vsel %vm273_vm0, %v452_v6, %v3377_v54  ;;  %2122 = vmatmul.mubr.bf16.gmra.mrb[12].mxu1 %v1865_v21 }
 0x1bb   : > { %v3386_v53 = vpop.permute.xlu1 %3385  ;;  %2651 = vmatprep.mubr.msk.bf16.mxu1 %vm273_vm0, %v1868_v45  ;;  %v1671_v7 = vsel %vm1643_vm2, %v1638_v9, %v3383_v58  ;;  %v1670_v8 = vsel %vm1643_vm2, %v1637_v10, %v3382_v59  ;;  %v713_v10 = vld [vmem:[#allocation2 + $0x19a] sm:$0xff] }
 0x1bc   : > { %v3388_v51 = vunpack.i.h.bf16 %v3386_v53  ;;  %v3387_v3 = vunpack.i.l.bf16 %v3386_v53  ;;  %v3401_v19 = vpop.permute.xlu0 %3400  ;;  %v714_v53 = vld [vmem:[#allocation2 + $0x1a2] sm:$0xff] }
 0x1bd   : > { %v3403_v22 = vunpack.i.h.bf16 %v3401_v19  ;;  %v3402_v13 = vunpack.i.l.bf16 %v3401_v19 }
 0x1be   : > { %v1703_v29 = vsel %vm1676_vm3, %v1670_v8, %v3387_v3  ;;  %v1704_v11 = vsel %vm1676_vm3, %v1671_v7, %v3388_v51 }
 0x1bf   : > { %v3396_v61 = vpop.permute.xlu1 %3395  ;;  %v1736_v20 = vsel %vm1709_vm4, %v1703_v29, %v3392_v28  ;;  %v1737_v49 = vsel %vm1709_vm4, %v1704_v11, %v3393_v14  ;;  %v1872_v29 = vpack.c.bf16 %v714_v53, %v713_v10 }
 0x1c0   : > { %v3398_v34 = vunpack.i.h.bf16 %v3396_v61  ;;  %v3397_v15 = vunpack.i.l.bf16 %v3396_v61  ;;  %v3411_v16 = vpop.permute.xlu0 %3410 }
 0x1c1   : > { %v3413_v56 = vunpack.i.h.bf16 %v3411_v16  ;;  %v3412_v37 = vunpack.i.l.bf16 %v3411_v16 }
 0x1c2   : > { %v1769_v18 = vsel %vm1742_vm5, %v1736_v20, %v3397_v15  ;;  %v1770_v12 = vsel %vm1742_vm5, %v1737_v49, %v3398_v34 }
 0x1c3   : > { %v3406_v2 = vpop.permute.xlu1 %3405  ;;  %v1802_v38 = vsel %vm1775_vm6, %v1769_v18, %v3402_v13  ;;  %v1803_v39 = vsel %vm1775_vm6, %v1770_v12, %v3403_v22  ;;  %v1640_v1 = vsel %vm273_vm0, %v455_v33, %v3413_v56  ;;  %v1639_v40 = vsel %vm273_vm0, %v454_v57, %v3412_v37 }
 0x1c4   : > { %v3408_v25 = vunpack.i.h.bf16 %v3406_v2  ;;  %v3407_v32 = vunpack.i.l.bf16 %v3406_v2  ;;  %v3421_v55 = vpop.permute.xlu0 %3420 }
 0x1c5   : > { %v3423_v23 = vunpack.i.h.bf16 %v3421_v55  ;;  %v3422_v24 = vunpack.i.l.bf16 %v3421_v55 }
 0x1c6   : > { %v1835_v35 = vsel %vm1808_vm7, %v1802_v38, %v3407_v32  ;;  %v1836_v60 = vsel %vm1808_vm7, %v1803_v39, %v3408_v25 }
 0x1c7   : > { %v3416_v41 = vpop.permute.xlu1 %3415  ;;  %v1867_v42 = vpack.c.bf16 %v1836_v60, %v1835_v35 }
 0x1c8   : > { %v3418_v4 = vunpack.i.h.bf16 %v3416_v41  ;;  %v3417_v52 = vunpack.i.l.bf16 %v3416_v41  ;;  %v3431_v62 = vpop.permute.xlu0 %3430 }
 0x1c9   : > { %2130 = vmatmul.mubr.bf16.gmra.mrb[16].mxu1 %v1867_v42  ;;  %v3433_v50 = vunpack.i.h.bf16 %v3431_v62  ;;  %v3432_v47 = vunpack.i.l.bf16 %v3431_v62 }
 0x1ca   : > { %v1672_v26 = vsel %vm1643_vm2, %v1639_v40, %v3417_v52  ;;  %v1673_v30 = vsel %vm1643_vm2, %v1640_v1, %v3418_v4  ;;  %2652 = vmatprep.mubr.msk.bf16.mxu1 %vm273_vm0, %v1870_v44 }
 0x1cb   : > { %v3426_v27 = vpop.permute.xlu1 %3425  ;;  %v1705_v43 = vsel %vm1676_vm3, %v1672_v26, %v3422_v24  ;;  %v1706_v48 = vsel %vm1676_vm3, %v1673_v30, %v3423_v23 }
 0x1cc   : > { %v3428_v5 = vunpack.i.h.bf16 %v3426_v27  ;;  %v3427_v46 = vunpack.i.l.bf16 %v3426_v27  ;;  %v3441_v6 = vpop.permute.xlu0 %3440 }
 0x1cd   : > { %v3443_v21 = vunpack.i.h.bf16 %v3441_v6  ;;  %v3442_v36 = vunpack.i.l.bf16 %v3441_v6 }
 0x1ce   : > { %v1738_v45 = vsel %vm1709_vm4, %v1705_v43, %v3427_v46  ;;  %v1739_v31 = vsel %vm1709_vm4, %v1706_v48, %v3428_v5 }
 0x1cf   : > { %v3436_v54 = vpop.permute.xlu1 %3435  ;;  %v1771_v51 = vsel %vm1742_vm5, %v1738_v45, %v3432_v47  ;;  %v1772_v3 = vsel %vm1742_vm5, %v1739_v31, %v3433_v50 }
 0x1d0   : > { %v3438_v58 = vunpack.i.h.bf16 %v3436_v54  ;;  %v3437_v59 = vunpack.i.l.bf16 %v3436_v54  ;;  %v3451_v9 = vpop.permute.xlu0 %3450 }
 0x1d1   : > { %v3453_v16 = vunpack.i.h.bf16 %v3451_v9  ;;  %v3452_v20 = vunpack.i.l.bf16 %v3451_v9 }
 0x1d2   : > { %v1804_v19 = vsel %vm1775_vm6, %v1771_v51, %v3437_v59  ;;  %v1805_v7 = vsel %vm1775_vm6, %v1772_v3, %v3438_v58 }
 0x1d3   : > { %v3446_v8 = vpop.permute.xlu1 %3445  ;;  %v1837_v14 = vsel %vm1808_vm7, %v1804_v19, %v3442_v36  ;;  %v1838_v28 = vsel %vm1808_vm7, %v1805_v7, %v3443_v21 }
 0x1d4   : > { %v3448_v11 = vunpack.i.h.bf16 %v3446_v8  ;;  %v3447_v61 = vunpack.i.l.bf16 %v3446_v8  ;;  %v1869_v34 = vpack.c.bf16 %v1838_v28, %v1837_v14  ;;  %v3461_v15 = vpop.permute.xlu0 %3460 }
 0x1d5   : > { %v3463_v37 = vunpack.i.h.bf16 %v3461_v15  ;;  %v3462_v25 = vunpack.i.l.bf16 %v3461_v15 }
 0x1d6   : > { %v1642_v49 = vsel %vm273_vm0, %v4376_v17, %v3448_v11  ;;  %v1641_v22 = vsel %vm273_vm0, %v4374_v63, %v3447_v61  ;;  %2138 = vmatmul.mubr.bf16.gmra.mrb[20].mxu1 %v1869_v34 }
 0x1d7   : > { %v3456_v13 = vpop.permute.xlu1 %3455  ;;  %2653 = vmatprep.mubr.msk.bf16.mxu1 %vm273_vm0, %v1872_v29  ;;  %v1675_v2 = vsel %vm1643_vm2, %v1642_v49, %v3453_v16  ;;  %v1674_v56 = vsel %vm1643_vm2, %v1641_v22, %v3452_v20 }
 0x1d8   : > { %v3458_v18 = vunpack.i.h.bf16 %v3456_v13  ;;  %v3457_v12 = vunpack.i.l.bf16 %v3456_v13  ;;  %v3471_v17 = vpop.permute.xlu0 %3470 }
 0x1d9   : > { %v3473_v35 = vunpack.i.h.bf16 %v3471_v17  ;;  %v3472_v60 = vunpack.i.l.bf16 %v3471_v17 }
 0x1da   : > { %v1707_v32 = vsel %vm1676_vm3, %v1674_v56, %v3457_v12  ;;  %v1708_v57 = vsel %vm1676_vm3, %v1675_v2, %v3458_v18  ;;  %v2262_v12 = vld [vmem:[#allocation8] sm:$0xff]  ;;  %v2263_v2 = vld [vmem:[#allocation8 + $0x8] sm:$0xff]  ;;  %v2264_v56 = vld [vmem:[#allocation8 + $0x10] sm:$0xff] }
 0x1db   : > { %v3466_v33 = vpop.permute.xlu1 %3465  ;;  %v1740_v38 = vsel %vm1709_vm4, %v1707_v32, %v3462_v25  ;;  %v1741_v39 = vsel %vm1709_vm4, %v1708_v57, %v3463_v37  ;;  %v3664_v37 = vmov 0.0|0.0   ;;  %v2794_v25 = vpack.c.bf16 %v2263_v2, %v2262_v12  ;;  %v2265_v32 = vld [vmem:[#allocation8 + $0x18] sm:$0xff] }
 0x1dc   : > { %v3468_v55 = vunpack.i.h.bf16 %v3466_v33  ;;  %v3467_v63 = vunpack.i.l.bf16 %v3466_v33  ;;  %2793 = vmatprep.subr.bf16.mxu1 %v3664_v37  ;;  %v2797_v57 = vpack.c.bf16 %v2265_v32, %v2264_v56 }
 0x1dd   : > { %2795 = vmatpush3.bf16.msra.mxu1 %v2794_v25 }
 0x1de   : > { %v1773_v44 = vsel %vm1742_vm5, %v1740_v38, %v3467_v63  ;;  %v1774_v1 = vsel %vm1742_vm5, %v1741_v39, %v3468_v55  ;;  %2796 = vmatprep.subr.bf16.mxu1 %v3664_v37 }
 0x1df   : > { %v3476_v40 = vpop.permute.xlu1 %3475  ;;  %v1806_v4 = vsel %vm1775_vm6, %v1773_v44, %v3472_v60  ;;  %v1807_v52 = vsel %vm1775_vm6, %v1774_v1, %v3473_v35  ;;  %v2266_v1 = vld [vmem:[#allocation8 + $0x20] sm:$0xff] }
 0x1e0   : > { %v3478_v41 = vunpack.i.h.bf16 %v3476_v40  ;;  %v3477_v42 = vunpack.i.l.bf16 %v3476_v40  ;;  %v2267_v40 = vld [vmem:[#allocation8 + $0x28] sm:$0xff] }
 0x1e1   : > { %2798 = vmatpush3.bf16.msra.mxu1 %v2797_v57 }
 0x1e2   : > { %v1839_v62 = vsel %vm1808_vm7, %v1806_v4, %v3477_v42  ;;  %v1840_v23 = vsel %vm1808_vm7, %v1807_v52, %v3478_v41  ;;  %2799 = vmatprep.subr.bf16.mxu1 %v3664_v37  ;;  %v2800_v42 = vpack.c.bf16 %v2267_v40, %v2266_v1  ;;  %v2268_v4 = vld [vmem:[#allocation8 + $0x30] sm:$0xff]  ;;  %v2269_v52 = vld [vmem:[#allocation8 + $0x38] sm:$0xff] }
 0x1e3   : > { %v1871_v24 = vpack.c.bf16 %v1840_v23, %v1839_v62  ;;  %v2803_v23 = vpack.c.bf16 %v2269_v52, %v2268_v4 }
 0x1e5   : > { %v4617_v26 = vpop.f32.mrb[0].mxu0  ;;  %2146 = vmatmul.mubr.bf16.gmra.mrb[24].mxu1 %v1871_v24 }
 0x1e6   : > { %v2029_v30 = vpop.f32.mrb[1].mxu0  ;;  %v2191_v5 = vmul.f32 %v4617_v26, %v4617_v26  ;;  %2801 = vmatpush3.bf16.msra.mxu1 %v2800_v42  ;;  %2790 = vmatprep.mubr.msk.f32.mxu1 %vm3665_vm8, %v3655_v0 }
 0x1e7   : > { %v4619_v27 = vpop.f32.mrb[2].mxu0  ;;  %2802 = vmatprep.subr.bf16.mxu1 %v3664_v37 }
 0x1e8   : > { %v2154_v46 = vadd.f32 %v4619_v27, %v4617_v26  ;;  %v2192_v6 = vmul.f32 %v4619_v27, %v4619_v27  ;;  %v2032_v43 = vpop.f32.mrb[3].mxu0 }
 0x1ea   : > { %v2223_v48 = vadd.f32 %v2192_v6, %v2191_v5  ;;  %v2271_v6 = vld [vmem:[#allocation8 + $0x48] sm:$0xff]  ;;  %2804 = vmatpush3.bf16.msra.mxu1 %v2803_v23 }
 0x1eb   : > { %2805 = vmatprep.subr.bf16.mxu1 %v3664_v37 }
 0x1f4   : > { %v4627_v50 = vpop.f32.mrb[4].mxu0 }
 0x1f5   : > { %v2155_v47 = vadd.f32 %v2154_v46, %v4627_v50  ;;  %v2193_v45 = vmul.f32 %v4627_v50, %v4627_v50  ;;  %v2037_v31 = vpop.f32.mrb[5].mxu0  ;;  %v2270_v46 = vld [vmem:[#allocation8 + $0x40] sm:$0xff] }
 0x1f6   : > { %v4632_v54 = vpop.f32.mrb[6].mxu0 }
 0x1f7   : > { %v2224_v21 = vadd.f32 %v2223_v48, %v2193_v45  ;;  %v2156_v36 = vadd.f32 %v2155_v47, %v4632_v54  ;;  %v2194_v58 = vmul.f32 %v4632_v54, %v4632_v54  ;;  %v2040_v59 = vpop.f32.mrb[7].mxu0  ;;  %v2806_v48 = vpack.c.bf16 %v2271_v6, %v2270_v46 }
 0x1f9   : > { %v2225_v9 = vadd.f32 %v2224_v21, %v2194_v58  ;;  %v2273_v58 = vld [vmem:[#allocation8 + $0x58] sm:$0xff]  ;;  %2807 = vmatpush3.bf16.msra.mxu1 %v2806_v48 }
 0x1fa   : > { %2808 = vmatprep.subr.bf16.mxu1 %v3664_v37 }
 0x201   : > { %v4637_v10 = vpop.f32.mrb[8].mxu0 }
 0x202   : > { %v2157_v53 = vadd.f32 %v2156_v36, %v4637_v10  ;;  %v2195_v51 = vmul.f32 %v4637_v10, %v4637_v10  ;;  %v2045_v3 = vpop.f32.mrb[9].mxu0  ;;  %v2272_v36 = vld [vmem:[#allocation8 + $0x50] sm:$0xff] }
 0x203   : > { %v4642_v19 = vpop.f32.mrb[10].mxu0 }
 0x204   : > { %v2226_v7 = vadd.f32 %v2225_v9, %v2195_v51  ;;  %v2158_v8 = vadd.f32 %v2157_v53, %v4642_v19  ;;  %v2196_v14 = vmul.f32 %v4642_v19, %v4642_v19  ;;  %v2048_v28 = vpop.f32.mrb[11].mxu0  ;;  %v2809_v9 = vpack.c.bf16 %v2273_v58, %v2272_v36 }
 0x206   : > { %v2227_v29 = vadd.f32 %v2226_v7, %v2196_v14  ;;  %2810 = vmatpush3.bf16.msra.mxu1 %v2809_v9  ;;  %v2275_v14 = vld [vmem:[#allocation8 + $0x68] sm:$0xff] }
 0x207   : > { %2811 = vmatprep.subr.bf16.mxu1 %v3664_v37 }
 0x210   : > { %v4647_v11 = vpop.f32.mrb[12].mxu0 }
 0x211   : > { %v2159_v61 = vadd.f32 %v2158_v8, %v4647_v11  ;;  %v2197_v34 = vmul.f32 %v4647_v11, %v4647_v11  ;;  %v2053_v15 = vpop.f32.mrb[13].mxu0  ;;  %v2274_v8 = vld [vmem:[#allocation8 + $0x60] sm:$0xff] }
 0x212   : > { %v4652_v16 = vpop.f32.mrb[14].mxu0  ;;  %v2812_v28 = vpack.c.bf16 %v2275_v14, %v2274_v8 }
 0x213   : > { %v2228_v20 = vadd.f32 %v2227_v29, %v2197_v34  ;;  %v2160_v49 = vadd.f32 %v2159_v61, %v4652_v16  ;;  %v2198_v22 = vmul.f32 %v4652_v16, %v4652_v16  ;;  %v2056_v13 = vpop.f32.mrb[15].mxu0  ;;  %v2276_v29 = vld [vmem:[#allocation8 + $0x70] sm:$0xff]  ;;  %v2277_v61 = vld [vmem:[#allocation8 + $0x78] sm:$0xff] }
 0x214   : > { %2813 = vmatpush3.bf16.msra.mxu1 %v2812_v28  ;;  %v2815_v34 = vpack.c.bf16 %v2277_v61, %v2276_v29 }
 0x215   : > { %v2229_v18 = vadd.f32 %v2228_v20, %v2198_v22  ;;  %2814 = vmatprep.subr.bf16.mxu1 %v3664_v37 }
 0x218   : > { %2816 = vmatpush3.bf16.msra.mxu1 %v2815_v34 }
 0x21d   : > { %v4657_v17 = vpop.f32.mrb[16].mxu0 }
 0x21e   : > { %v2161_v33 = vadd.f32 %v2160_v49, %v4657_v17  ;;  %v2199_v55 = vmul.f32 %v4657_v17, %v4657_v17  ;;  %v2061_v63 = vpop.f32.mrb[17].mxu0 }
 0x21f   : > { %v4662_v38 = vpop.f32.mrb[18].mxu0 }
 0x220   : > { %v2230_v39 = vadd.f32 %v2229_v18, %v2199_v55  ;;  %v2162_v35 = vadd.f32 %v2161_v33, %v4662_v38  ;;  %v2200_v60 = vmul.f32 %v4662_v38, %v4662_v38  ;;  %v2064_v44 = vpop.f32.mrb[19].mxu0 }
 0x222   : > { %v2231_v41 = vadd.f32 %v2230_v39, %v2200_v60 }
 0x22d   : > { %v4667_v62 = vpop.f32.mrb[20].mxu0 }
 0x22e   : > { %v2163_v24 = vadd.f32 %v2162_v35, %v4667_v62  ;;  %v2201_v30 = vmul.f32 %v4667_v62, %v4667_v62  ;;  %v2069_v5 = vpop.f32.mrb[21].mxu0 }
 0x22f   : > { %v4672_v43 = vpop.f32.mrb[22].mxu0 }
 0x230   : > { %v2232_v47 = vadd.f32 %v2231_v41, %v2201_v30  ;;  %v2164_v45 = vadd.f32 %v2163_v24, %v4672_v43  ;;  %v2202_v31 = vmul.f32 %v4672_v43, %v4672_v43  ;;  %v2072_v21 = vpop.f32.mrb[23].mxu0 }
 0x232   : > { %v2233_v59 = vadd.f32 %v2232_v47, %v2202_v31 }
 0x240   : > { %v4677_v53 = vpop.f32.mrb[0].mxu1 }
 0x241   : > { %v2101_v51 = vpop.f32.mrb[1].mxu1  ;;  %v2209_v21 = vmul.f32 %v4677_v53, %v4677_v53 }
 0x242   : > { %v4679_v3 = vpop.f32.mrb[2].mxu1 }
 0x243   : > { %v2104_v7 = vpop.f32.mrb[3].mxu1 }
 0x249   : > { %v4682_v15 = vpop.f32.mrb[24].mxu0 }
 0x24a   : > { %v2165_v20 = vadd.f32 %v2164_v45, %v4682_v15  ;;  %v2203_v49 = vmul.f32 %v4682_v15, %v4682_v15  ;;  %v2077_v22 = vpop.f32.mrb[25].mxu0 }
 0x24b   : > { %v4687_v13 = vpop.f32.mrb[26].mxu0 }
 0x24c   : > { %v2234_v18 = vadd.f32 %v2233_v59, %v2203_v49  ;;  %v2166_v12 = vadd.f32 %v2165_v20, %v4687_v13  ;;  %v2204_v2 = vmul.f32 %v4687_v13, %v4687_v13  ;;  %v2080_v56 = vpop.f32.mrb[27].mxu0  ;;  %v2210_v59 = vmul.f32 %v4679_v3, %v4679_v3 }
 0x24e   : > { %v2235_v37 = vadd.f32 %v2234_v18, %v2204_v2 }
 0x25c   : > { %v4692_v0 = vpop.f32.mrb[4].mxu1 }
 0x25d   : > { %v2109_v25 = vpop.f32.mrb[5].mxu1  ;;  %v2211_v7 = vmul.f32 %v4692_v0, %v4692_v0 }
 0x25e   : > { %v4694_v32 = vpop.f32.mrb[6].mxu1 }
 0x25f   : > { %v2112_v57 = vpop.f32.mrb[7].mxu1  ;;  %v2212_v28 = vmul.f32 %v4694_v32, %v4694_v32 }
 0x265   : > { %v4696_v33 = vpop.f32.mrb[28].mxu0 }
 0x266   : > { %v2167_v55 = vadd.f32 %v2166_v12, %v4696_v33  ;;  %v2205_v63 = vmul.f32 %v4696_v33, %v4696_v33  ;;  %v2085_v39 = vpop.f32.mrb[29].mxu0 }
 0x267   : > { %v4701_v35 = vpop.f32.mrb[30].mxu0 }
 0x268   : > { %v2236_v60 = vadd.f32 %v2235_v37, %v2205_v63  ;;  %v2168_v44 = vadd.f32 %v2167_v55, %v4701_v35  ;;  %v2206_v1 = vmul.f32 %v4701_v35, %v4701_v35  ;;  %v2088_v40 = vpop.f32.mrb[31].mxu0 }
 0x26a   : > { %v2237_v41 = vadd.f32 %v2236_v60, %v2206_v1 }
 0x278   : > { %v4706_v42 = vpop.f32.mrb[8].mxu1 }
 0x279   : > { %v2117_v4 = vpop.f32.mrb[9].mxu1  ;;  %v2213_v20 = vmul.f32 %v4706_v42, %v4706_v42 }
 0x27a   : > { %v4708_v52 = vpop.f32.mrb[10].mxu1 }
 0x27b   : > { %v2120_v23 = vpop.f32.mrb[11].mxu1  ;;  %v2214_v2 = vmul.f32 %v4708_v52, %v4708_v52 }
 0x281   : > { %v4710_v24 = vpop.f32.mrb[32].mxu0 }
 0x282   : > { %v2169_v30 = vadd.f32 %v2168_v44, %v4710_v24  ;;  %v2207_v5 = vmul.f32 %v4710_v24, %v4710_v24  ;;  %v2093_v46 = vpop.f32.mrb[33].mxu0 }
 0x283   : > { %v4715_v6 = vpop.f32.mrb[34].mxu0 }
 0x284   : > { %v2238_v48 = vadd.f32 %v2237_v41, %v2207_v5  ;;  %v2170_v47 = vadd.f32 %v2169_v30, %v4715_v6  ;;  %v2208_v45 = vmul.f32 %v4715_v6, %v4715_v6  ;;  %v2096_v31 = vpop.f32.mrb[35].mxu0 }
 0x286   : > { %v2171_v36 = vadd.f32 %v2170_v47, %v4677_v53  ;;  %v2239_v58 = vadd.f32 %v2238_v48, %v2208_v45 }
 0x288   : > { %v2172_v9 = vadd.f32 %v2171_v36, %v4679_v3  ;;  %v2240_v51 = vadd.f32 %v2239_v58, %v2209_v21 }
 0x28a   : > { %v2173_v8 = vadd.f32 %v2172_v9, %v4692_v0  ;;  %v2241_v14 = vadd.f32 %v2240_v51, %v2210_v59 }
 0x28c   : > { %v2242_v29 = vadd.f32 %v2241_v14, %v2211_v7  ;;  %v2174_v61 = vadd.f32 %v2173_v8, %v4694_v32 }
 0x28d   : > { %v4732_v34 = vpop.f32.mrb[12].mxu1 }
 0x28e   : > { %v2175_v49 = vadd.f32 %v2174_v61, %v4706_v42  ;;  %v2243_v22 = vadd.f32 %v2242_v29, %v2212_v28  ;;  %v2125_v18 = vpop.f32.mrb[13].mxu1  ;;  %v2215_v55 = vmul.f32 %v4732_v34, %v4732_v34 }
 0x28f   : > { %v4737_v12 = vpop.f32.mrb[14].mxu1 }
 0x290   : > { %v2176_v56 = vadd.f32 %v2175_v49, %v4708_v52  ;;  %v2244_v37 = vadd.f32 %v2243_v22, %v2213_v20  ;;  %v2128_v25 = vpop.f32.mrb[15].mxu1  ;;  %v2216_v44 = vmul.f32 %v4737_v12, %v4737_v12 }
 0x292   : > { %v2177_v57 = vadd.f32 %v2176_v56, %v4732_v34  ;;  %v2245_v63 = vadd.f32 %v2244_v37, %v2214_v2 }
 0x294   : > { %v2246_v39 = vadd.f32 %v2245_v63, %v2215_v55  ;;  %v2178_v60 = vadd.f32 %v2177_v57, %v4737_v12 }
 0x296   : > { %v2247_v1 = vadd.f32 %v2246_v39, %v2216_v44 }
 0x29c   : > { %v4748_v40 = vpop.f32.mrb[16].mxu1 }
 0x29d   : > { %v2179_v41 = vadd.f32 %v2178_v60, %v4748_v40  ;;  %v2217_v4 = vmul.f32 %v4748_v40, %v4748_v40  ;;  %v2133_v23 = vpop.f32.mrb[17].mxu1 }
 0x29e   : > { %v4753_v30 = vpop.f32.mrb[18].mxu1 }
 0x29f   : > { %v2248_v5 = vadd.f32 %v2247_v1, %v2217_v4  ;;  %v2180_v46 = vadd.f32 %v2179_v41, %v4753_v30  ;;  %v2218_v48 = vmul.f32 %v4753_v30, %v4753_v30  ;;  %v2136_v47 = vpop.f32.mrb[19].mxu1 }
 0x2a1   : > { %v2249_v45 = vadd.f32 %v2248_v5, %v2218_v48 }
 0x2a9   : > { %v4758_v31 = vpop.f32.mrb[20].mxu1 }
 0x2aa   : > { %v2181_v21 = vadd.f32 %v2180_v46, %v4758_v31  ;;  %v2219_v36 = vmul.f32 %v4758_v31, %v4758_v31  ;;  %v2141_v58 = vpop.f32.mrb[21].mxu1 }
 0x2ab   : > { %v4763_v59 = vpop.f32.mrb[22].mxu1 }
 0x2ac   : > { %v2250_v9 = vadd.f32 %v2249_v45, %v2219_v36  ;;  %v2182_v51 = vadd.f32 %v2181_v21, %v4763_v59  ;;  %v2220_v7 = vmul.f32 %v4763_v59, %v4763_v59  ;;  %v2144_v8 = vpop.f32.mrb[23].mxu1 }
 0x2ae   : > { %v2251_v14 = vadd.f32 %v2250_v9, %v2220_v7  ;;  %v2372_v7 = vlaneseq }
 0x2b0   : > { %v2373_v8 = vshrl.u32 %v2372_v7, 7 }
 0x2b8   : > { %v4768_v28 = vpop.f32.mrb[24].mxu1 }
 0x2b9   : > { %v2183_v29 = vadd.f32 %v2182_v51, %v4768_v28  ;;  %v2221_v61 = vmul.f32 %v4768_v28, %v4768_v28  ;;  %v2149_v20 = vpop.f32.mrb[25].mxu1 }
 0x2ba   : > { %v4773_v49 = vpop.f32.mrb[26].mxu1 }
 0x2bb   : > { %v2252_v22 = vadd.f32 %v2251_v14, %v2221_v61  ;;  %v2184_v18 = vadd.f32 %v2183_v29, %v4773_v49  ;;  %v2222_v2 = vmul.f32 %v4773_v49, %v4773_v49  ;;  %v2152_v56 = vpop.f32.mrb[27].mxu1  ;;  %v2654_v14 = vld [vmem:[%s4949_s2] ss:$0 sm:$0xff]  ;;  %v2374_v29 = vsub.s32 1, %v2373_v8 }
 0x2bc   : > { %v2411_v56 = vsub.s32 0, %v2373_v8 }
 0x2bd   : > { %v2185_v37 = vrot.slane %v2184_v18, 4  ;;  %v2253_v25 = vadd.f32 %v2252_v22, %v2222_v2  ;;  %v2366_v2 = vld [vmem:[%s4950_s3] sm:$0x1] }
 0x2bf   : > { %v2186_v57 = vadd.f32 %v2185_v37, %v2184_v18  ;;  %v2254_v55 = vrot.slane %v2253_v25, 4 }
 0x2c1   : > { %v2187_v63 = vrot.slane %v2186_v57, 2  ;;  %v2255_v39 = vadd.f32 %v2254_v55, %v2253_v25 }
 0x2c3   : > { %v2188_v60 = vadd.f32 %v2187_v63, %v2186_v57  ;;  %v2256_v44 = vrot.slane %v2255_v39, 2 }
 0x2c5   : > { %v2189_v1 = vrot.slane %v2188_v60, 1  ;;  %v2257_v41 = vadd.f32 %v2256_v44, %v2255_v39 }
 0x2c7   : > { %v2258_v4 = vrot.slane %v2257_v41, 1  ;;  %v2190_v23 = vadd.f32 %v2189_v1, %v2188_v60 }
 0x2c9   : > { %v2259_v5 = vadd.f32 %v2258_v4, %v2257_v41 }
 0x2cb   : > { %v2261_v46 = vsel %vm2260_vm9, %v2190_v23, %v2259_v5 }
 0x2cc   : > { %2791 = vmatmul.mubr.f32.vlgmr.msra.gmra.mrb[28].mxu1 %v2261_v46 }
 0x39f   : > { %v2344_v48 = vpop.f32.mrb[28].mxu1 }
 0x3a0   : > { %v2349_v47 = vmul.f32 0.001953125, %v2344_v48  ;;  %v2792_v45 = vpop.f32.mrb[29].mxu1 }
 0x3a2   : > { %v2350_v21 = vmul.f32 %v2349_v47, %v2349_v47 }
 0x3a4   : > { %v2352_v36 = vrot.slane %v2350_v21, 7 }
 0x3a6   : > { %v2354_v58 = vsub.f32 %v2349_v47, %v2352_v36 }
 0x3a8   : > { %v2355_v9 = vmax.f32 %v2354_v58, 0.0 }
 0x3aa   : > { %v2356_v51 = vadd.f32 1e-05, %v2355_v9 }
 0x3ac   : > { %3488 = vrsqrt.f32 %v2356_v51 }
 0x3b6   : > { %v3489_v61 = vpop.eup %3488 }
 0x3b7   : > { %v2365_v20 = vmul.f32 %v3489_v61, %v2654_v14 }
 0x3b9   : > { %v2368_v22 = vrot.slane %v2365_v20, 1  ;;  %v2375_v18 = vrot.slane %v2365_v20, %v2374_v29 }
 0x3bb   : > { %v2370_v37 = vmul.f32 %v2368_v22, %v2349_v47  ;;  %v2376_v25 = vmul.f32 %v2375_v18, %v4617_v26  ;;  %v2377_v57 = vmul.f32 %v2375_v18, %v4619_v27  ;;  %v2378_v55 = vmul.f32 %v2375_v18, %v4627_v50 }
 0x3bc   : > { %v2379_v63 = vmul.f32 %v2375_v18, %v4632_v54  ;;  %v2380_v39 = vmul.f32 %v2375_v18, %v4637_v10  ;;  %v2381_v60 = vmul.f32 %v2375_v18, %v4642_v19  ;;  %v2382_v44 = vmul.f32 %v2375_v18, %v4647_v11 }
 0x3bd   : > { %v2371_v1 = vsub.f32 %v2366_v2, %v2370_v37  ;;  %v2383_v41 = vmul.f32 %v2375_v18, %v4652_v16  ;;  %v2384_v4 = vmul.f32 %v2375_v18, %v4657_v17  ;;  %v2385_v23 = vmul.f32 %v2375_v18, %v4662_v38 }
 0x3be   : > { %v2386_v26 = vmul.f32 %v2375_v18, %v4667_v62  ;;  %v2387_v27 = vmul.f32 %v2375_v18, %v4672_v43  ;;  %v2388_v50 = vmul.f32 %v2375_v18, %v4682_v15  ;;  %v2389_v54 = vmul.f32 %v2375_v18, %v4687_v13 }
 0x3bf   : > { %v2412_v10 = vrot.slane %v2371_v1, %v2411_v56  ;;  %v2390_v19 = vmul.f32 %v2375_v18, %v4696_v33  ;;  %v2391_v11 = vmul.f32 %v2375_v18, %v4701_v35  ;;  %v2392_v5 = vmul.f32 %v2375_v18, %v4710_v24 }
 0x3c0   : > { %v2393_v16 = vmul.f32 %v2375_v18, %v4715_v6  ;;  %v2394_v17 = vmul.f32 %v2375_v18, %v4677_v53  ;;  %v2395_v38 = vmul.f32 %v2375_v18, %v4679_v3  ;;  %v2396_v62 = vmul.f32 %v2375_v18, %v4692_v0 }
 0x3c1   : > { %v2397_v43 = vmul.f32 %v2375_v18, %v4694_v32  ;;  %v2398_v15 = vmul.f32 %v2375_v18, %v4706_v42  ;;  %v2399_v13 = vmul.f32 %v2375_v18, %v4708_v52  ;;  %v2400_v33 = vmul.f32 %v2375_v18, %v4732_v34 }
 0x3c2   : > { %v2401_v35 = vmul.f32 %v2375_v18, %v4737_v12  ;;  %v2402_v24 = vmul.f32 %v2375_v18, %v4748_v40  ;;  %v2403_v6 = vmul.f32 %v2375_v18, %v4753_v30  ;;  %v2404_v53 = vmul.f32 %v2375_v18, %v4758_v31 }
 0x3c3   : > { %v2405_v3 = vmul.f32 %v2375_v18, %v4763_v59  ;;  %v2406_v0 = vmul.f32 %v2375_v18, %v4768_v28  ;;  %v2407_v32 = vmul.f32 %v2375_v18, %v4773_v49  ;;  %v2414_v42 = vadd.f32 %v2412_v10, %v2376_v25 }
 0x3c4   : > { %v2415_v46 = vadd.f32 %v2412_v10, %v2377_v57  ;;  %v2416_v52 = vadd.f32 %v2412_v10, %v2378_v55  ;;  %v2417_v48 = vadd.f32 %v2412_v10, %v2379_v63  ;;  %v2418_v34 = vadd.f32 %v2412_v10, %v2380_v39 }
 0x3c5   : > { %v2419_v47 = vadd.f32 %v2412_v10, %v2381_v60  ;;  %v2420_v12 = vadd.f32 %v2412_v10, %v2382_v44  ;;  %v2421_v45 = vadd.f32 %v2412_v10, %v2383_v41  ;;  %v2422_v40 = vadd.f32 %v2412_v10, %v2384_v4 }
 0x3c6   : > { %v2423_v21 = vadd.f32 %v2412_v10, %v2385_v23  ;;  %v2424_v30 = vadd.f32 %v2412_v10, %v2386_v26  ;;  %v2425_v36 = vadd.f32 %v2412_v10, %v2387_v27  ;;  %v2426_v31 = vadd.f32 %v2412_v10, %v2388_v50 }
 0x3c7   : > { %v2427_v59 = vadd.f32 %v2412_v10, %v2389_v54  ;;  %v2428_v58 = vadd.f32 %v2412_v10, %v2390_v19  ;;  %v2429_v9 = vadd.f32 %v2412_v10, %v2391_v11  ;;  %v2430_v28 = vadd.f32 %v2412_v10, %v2392_v5 }
 0x3c8   : > { %v4817_v51 = vadd.f32 %v2412_v10, %v2393_v16  ;;  %v4819_v49 = vadd.f32 %v2412_v10, %v2394_v17  ;;  %v4821_v7 = vadd.f32 %v2412_v10, %v2395_v38  ;;  %v4823_v8 = vadd.f32 %v2412_v10, %v2396_v62 }
 0x3c9   : > { %v4825_v14 = vadd.f32 %v2412_v10, %v2397_v43  ;;  %v4827_v29 = vadd.f32 %v2412_v10, %v2398_v15  ;;  %v4829_v61 = vadd.f32 %v2412_v10, %v2399_v13  ;;  %v4831_v20 = vadd.f32 %v2412_v10, %v2400_v33 }
 0x3ca   : > { %v4833_v22 = vadd.f32 %v2412_v10, %v2401_v35  ;;  %v4835_v18 = vadd.f32 %v2412_v10, %v2402_v24  ;;  %v4837_v2 = vadd.f32 %v2412_v10, %v2403_v6  ;;  %v4839_v56 = vadd.f32 %v2412_v10, %v2404_v53 }
 0x3cb   : > { %v4841_v37 = vadd.f32 %v2412_v10, %v2405_v3  ;;  %v4843_v25 = vadd.f32 %v2412_v10, %v2406_v0  ;;  %v4845_v57 = vadd.f32 %v2412_v10, %v2407_v32  ;;  %v2446_v55 = vmax.f32 %v2414_v42, 0.0 }
 0x3cc   : > { %v2447_v63 = vmax.f32 %v2415_v46, 0.0  ;;  %v2448_v39 = vmax.f32 %v2416_v52, 0.0  ;;  %v2449_v60 = vmax.f32 %v2417_v48, 0.0  ;;  %v2450_v44 = vmax.f32 %v2418_v34, 0.0 }
 0x3cd   : > { %v2451_v1 = vmax.f32 %v2419_v47, 0.0  ;;  %v2452_v41 = vmax.f32 %v2420_v12, 0.0  ;;  %v2453_v4 = vmax.f32 %v2421_v45, 0.0  ;;  %v2454_v23 = vmax.f32 %v2422_v40, 0.0  ;;  %2478 = vst [vmem:[%s4847_s6] sm:$0xff] %v2446_v55 }
 0x3ce   : > { %v2455_v26 = vmax.f32 %v2423_v21, 0.0  ;;  %v2456_v27 = vmax.f32 %v2424_v30, 0.0  ;;  %v2457_v50 = vmax.f32 %v2425_v36, 0.0  ;;  %v2458_v54 = vmax.f32 %v2426_v31, 0.0  ;;  %2479 = vst [vmem:[%s4847_s6 + $0x8] sm:$0xff] %v2447_v63  ;;  %2480 = vst [vmem:[%s4847_s6 + $0x10] sm:$0xff] %v2448_v39 }
 0x3cf   : > { %2481 = vst [vmem:[%s4847_s6 + $0x18] sm:$0xff] %v2449_v60  ;;  %2482 = vst [vmem:[%s4847_s6 + $0x20] sm:$0xff] %v2450_v44  ;;  %v2459_v10 = vmax.f32 %v2427_v59, 0.0  ;;  %v2460_v19 = vmax.f32 %v2428_v58, 0.0  ;;  %v2461_v11 = vmax.f32 %v2429_v9, 0.0  ;;  %v2462_v5 = vmax.f32 %v2430_v28, 0.0 }
 0x3d0   : > { %2483 = vst [vmem:[%s4847_s6 + $0x28] sm:$0xff] %v2451_v1  ;;  %2484 = vst [vmem:[%s4847_s6 + $0x30] sm:$0xff] %v2452_v41  ;;  %v2463_v16 = vmax.f32 %v4817_v51, 0.0  ;;  %v2464_v17 = vmax.f32 %v4819_v49, 0.0  ;;  %v2465_v38 = vmax.f32 %v4821_v7, 0.0  ;;  %v2466_v62 = vmax.f32 %v4823_v8, 0.0 }
 0x3d1   : > { %2485 = vst [vmem:[%s4847_s6 + $0x38] sm:$0xff] %v2453_v4  ;;  %2486 = vst [vmem:[%s4847_s6 + $0x40] sm:$0xff] %v2454_v23  ;;  %v2467_v43 = vmax.f32 %v4825_v14, 0.0  ;;  %v2468_v15 = vmax.f32 %v4827_v29, 0.0  ;;  %v2469_v13 = vmax.f32 %v4829_v61, 0.0  ;;  %v2470_v33 = vmax.f32 %v4831_v20, 0.0 }
 0x3d2   : > { %2487 = vst [vmem:[%s4847_s6 + $0x48] sm:$0xff] %v2455_v26  ;;  %2488 = vst [vmem:[%s4847_s6 + $0x50] sm:$0xff] %v2456_v27  ;;  %v2471_v35 = vmax.f32 %v4833_v22, 0.0  ;;  %v2472_v24 = vmax.f32 %v4835_v18, 0.0  ;;  %v2473_v6 = vmax.f32 %v4837_v2, 0.0  ;;  %v2474_v53 = vmax.f32 %v4839_v56, 0.0 }
 0x3d3   : > { %2489 = vst [vmem:[%s4847_s6 + $0x58] sm:$0xff] %v2457_v50  ;;  %2490 = vst [vmem:[%s4847_s6 + $0x60] sm:$0xff] %v2458_v54  ;;  %v2475_v3 = vmax.f32 %v4841_v37, 0.0  ;;  %v2476_v0 = vmax.f32 %v4843_v25, 0.0  ;;  %v2477_v32 = vmax.f32 %v4845_v57, 0.0 }
 0x3d4   : > { %2491 = vst [vmem:[%s4847_s6 + $0x68] sm:$0xff] %v2459_v10  ;;  %2492 = vst [vmem:[%s4847_s6 + $0x70] sm:$0xff] %v2460_v19 }
 0x3d5   : > { %2493 = vst [vmem:[%s4847_s6 + $0x78] sm:$0xff] %v2461_v11  ;;  %2494 = vst [vmem:[%s4847_s6 + $0x80] sm:$0xff] %v2462_v5 }
 0x3d6   : > { %2495 = vst [vmem:[%s4847_s6 + $0x88] sm:$0xff] %v2463_v16  ;;  %2496 = vst [vmem:[%s4847_s6 + $0x90] sm:$0xff] %v2464_v17 }
 0x3d7   : > { %2497 = vst [vmem:[%s4847_s6 + $0x98] sm:$0xff] %v2465_v38  ;;  %2498 = vst [vmem:[%s4847_s6 + $0xa0] sm:$0xff] %v2466_v62 }
 0x3d8   : > { %2499 = vst [vmem:[%s4847_s6 + $0xa8] sm:$0xff] %v2467_v43  ;;  %2500 = vst [vmem:[%s4847_s6 + $0xb0] sm:$0xff] %v2468_v15 }
 0x3d9   : > { %2501 = vst [vmem:[%s4847_s6 + $0xb8] sm:$0xff] %v2469_v13  ;;  %2502 = vst [vmem:[%s4847_s6 + $0xc0] sm:$0xff] %v2470_v33 }
 0x3da   : > { %2503 = vst [vmem:[%s4847_s6 + $0xc8] sm:$0xff] %v2471_v35  ;;  %2504 = vst [vmem:[%s4847_s6 + $0xd0] sm:$0xff] %v2472_v24 }
 0x3db   : > { %2505 = vst [vmem:[%s4847_s6 + $0xd8] sm:$0xff] %v2473_v6  ;;  %2506 = vst [vmem:[%s4847_s6 + $0xe0] sm:$0xff] %v2474_v53 }
 0x3dc   : > { %2507 = vst [vmem:[%s4847_s6 + $0xe8] sm:$0xff] %v2475_v3  ;;  %2508 = vst [vmem:[%s4847_s6 + $0xf0] sm:$0xff] %v2476_v0 }
 0x3dd   : > { %2509 = vst [vmem:[%s4847_s6 + $0xf8] sm:$0xff] %v2477_v32 }
 0x3de   : > { %3589 = shalt.err (!%p3586_p1)
}
 0x3df   : > { %s3590_s17 = scalar_lea.hbm %s4887_s26, 4096  ;;  %s3594_s30 = scalar_lea.hbm %s4952_s5, 8192 }
 0x3e0   : > { %p3591_p13 = scmp.ne.s32.totalorder %s4887_s26, %s3590_s17  ;;  %p3595_p4 = scmp.lt.u32.totalorder %s4887_s26, %s4952_s5 }
 0x3e1   : > { %p3596_p7 = scmp.lt.u32.totalorder %s3594_s30, %s3590_s17  ;;  %p3598_p11 = scmp.lt.u32.totalorder %s3590_s17, %s4887_s26 }
 0x3e2   : > { %p3592_p6 = pnand %p3591_p13, %p4966_p0 }
 0x3e3   : > { %p3597_p8 = por %p3596_p7, %p3595_p4 }
 0x3e4   : > { %p3593_p10 = pneg %p3592_p6 }
 0x3e5   : > { %p3599_p2 = por %p3598_p11, %p3597_p8 }
 0x3e7   : > { %p3600_p3 = pnand %p3599_p2, %p3593_p10 }
 0x3e9   : > { %3603 = shalt.err (!%p3600_p3)
}
 0x3ea   : > { %s3667_s10 = smov 128   ;;  %s3668_s22 = smov 8  }
 0x3eb   : > { %2845 = dma.vmem_to_hbm [thread:$0]  (%p4966_p0), %s4889_s11, 4096, %s4887_s26, %s2511_s15, %s3667_s10, %s3667_s10, %s3668_s22  }
 0x3ec PF: > { %s2539_s24 = sand.u32 1, %s3634_s18   ;;  %p4967_p5 = scmp.ne.s32.totalorder %s4957_s25, 0 }
 0x3ed   : > { %p4968_p9 = scmp.ge.s32.totalorder %s3646_s21, 2  ;;  %s2540_s16 = scalar_lea.sflag [#allocation5], %s2539_s24 }
 0x3ef   : > { %p2859_p12 = pnand %p4968_p9, %p4967_p5 }
 0x3f1   : > { %3629 = dma.done.wait (!%p2859_p12), %s2540_s16, 4096  }
 0x3f2   : > { %3631 = vsyncadd (!%p2859_p12), %s2540_s16, 4294963200  ;;  %p19_p1 = scmp.ge.s32.totalorder %s3812_s23, 4   ;;  %s4969_s18 = smov %s3638_s19 }
 0x3f3   : > { %s4970_s19 = smov %s3642_s20  ;;  %s4971_s20 = smov %s3821_s7 }
 0x3f4   : > { %s4972_s21 = smov %s3812_s23  ;;  %21 = sbr.rel (!%p19_p1) target bundleno = 6 (0x6), region = 95 }
 0x3fb   :  { %2545 = vsyncpa [#allocation4], 1 }
 0x3fc   :  { %2547 = vsyncpa [#allocation4 + $0x1], 1 }
 0x3fd   :  { %2548 = vsyncpa [#allocation7], 1 }
 0x3fe   :  { %2549 = vsyncpa [#allocation5], 1 }
 0x3ff   :  { %2551 = vsyncpa [#allocation5 + $0x1], 1 }

</bundles_post_ra>
